<compile_context>
chip_gen: v5e
topology: v5e:2x2
jax: 0.10.0
libtpu: 0.0.40
codegen_flags: <defaults>
</compile_context>

<pallas_src>
import functools

import jax
import jax.numpy as jnp
from jax.experimental import pallas as pl
from jax.experimental.pallas import tpu as pltpu

NUM_GROUPS = 32          # standard VAE/SD GroupNorm(in_channels) convention
GN_EPS = 1e-6            # TODO(synk): GroupNorm class not shown; assuming 32 groups, eps=1e-6, affine=True


def attn_block_kernel(xq_ref, xkv_ref, scale_ref, shift_ref,
                      wq_ref, bq_ref, wk_ref, bk_ref, wv_ref, bv_ref,
                      wp_ref, bp_ref, o_ref,
                      q_sc, m_sc, l_sc, acc_sc, k_cache, v_cache,
                      *, hw, tk, mask_kv):
    qi = pl.program_id(1)
    ki = pl.program_id(2)
    nk = pl.num_programs(2)

    scale = scale_ref[0]          # (1, C) f32: per-batch gamma * rstd
    shift = shift_ref[0]          # (1, C) f32: per-batch beta - mean*gamma*rstd

    # ---- once per (batch, q-tile): project q, reset online-softmax state.
    @pl.when(ki == 0)
    def _():
        xn_q = (xq_ref[0].astype(jnp.float32) * scale + shift).astype(jnp.bfloat16)
        q = jnp.dot(xn_q, wq_ref[...],
                    preferred_element_type=jnp.float32) + bq_ref[...]
        q_sc[...] = q.astype(jnp.bfloat16)   # C^-0.5 already folded into wq/bq
        m_sc[...] = jnp.full_like(m_sc, -jnp.inf)
        l_sc[...] = jnp.zeros_like(l_sc)
        acc_sc[...] = jnp.zeros_like(acc_sc)

    # ---- once per (batch, kv-tile): GN affine + k/v projection into the
    # VMEM-resident cache (only during the qi == 0 sweep; reused afterwards).
    @pl.when(qi == 0)
    def _():
        xn_kv = (xkv_ref[0].astype(jnp.float32) * scale + shift).astype(jnp.bfloat16)
        k_cache[ki] = (jnp.dot(xn_kv, wk_ref[...], preferred_element_type=jnp.float32)
                       + bk_ref[...]).astype(jnp.bfloat16)
        v_cache[ki] = (jnp.dot(xn_kv, wv_ref[...], preferred_element_type=jnp.float32)
                       + bv_ref[...]).astype(jnp.bfloat16)

    k = k_cache[ki]               # (tk, C) bf16
    v = v_cache[ki]               # (tk, C) bf16

    # ---- scores for this (q-tile, kv-tile) block; f32 accumulation on MXU.
    s = jax.lax.dot_general(q_sc[...], k, (((1,), (1,)), ((), ())),
                            preferred_element_type=jnp.float32)       # (tq, tk)
    if mask_kv:   # only emitted when HW was padded up to the tile size
        col = ki * tk + jax.lax.broadcasted_iota(jnp.int32, s.shape, 1)
        s = jnp.where(col < hw, s, -1e30)   # f32 mask (never downcast first)

    # ---- online softmax (f32; v5e-safe), normalization deferred.
    m_prev = m_sc[...]
    m_new = jnp.maximum(m_prev, jnp.max(s, axis=-1, keepdims=True))
    alpha = jnp.exp(m_prev - m_new)
    p = jnp.exp(s - m_new)
    l_sc[...] = alpha * l_sc[...] + jnp.sum(p, axis=-1, keepdims=True)
    acc_sc[...] = alpha * acc_sc[...] + jnp.dot(
        p.astype(jnp.bfloat16), v, preferred_element_type=jnp.float32)
    m_sc[...] = m_new

    # ---- finalize: normalize, proj_out, residual add, write in input dtype.
    @pl.when(ki == nk - 1)
    def _():
        attn = acc_sc[...] * pl.reciprocal(l_sc[...], approx=True)
        y = jnp.dot(attn.astype(jnp.bfloat16), wp_ref[...],
                    preferred_element_type=jnp.float32) + bp_ref[...]
        o_ref[0] = (y + xq_ref[0].astype(jnp.float32)).astype(o_ref.dtype)


def _round_up(x, m):
    return ((x + m - 1) // m) * m


def _vmem_limit_bytes():
    """Generation-aware VMEM cap: ~85% of capacity (54 MiB v7x, 108 MiB v5e/v6e)."""
    try:
        cap = int(pltpu.get_tpu_info().vmem_capacity_bytes)
    except Exception:
        cap = 64 * 2**20        # conservative fallback: assume smallest (v7x) VMEM
    return max(32 * 2**20, int(cap * 0.85))


def attn_block_pallas(x_nchw, params, *, num_groups=NUM_GROUPS, eps=GN_EPS,
                      tile=512):
    B, C, H, W = x_nchw.shape
    G = num_groups
    assert C % G == 0, "in_channels must be divisible by the number of groups"
    cg = C // G
    HW = H * W

    # ---- GroupNorm statistics: tiny per-(B, G) reduction in f32, two-pass
    # (centered) variance. The affine application itself is fused in-kernel.
    xg = x_nchw.reshape(B, G, cg * HW).astype(jnp.float32)
    mean = jnp.mean(xg, axis=-1)                                     # (B, G)
    var = jnp.mean(jnp.square(xg - mean[:, :, None]), axis=-1)       # (B, G)
    rstd = jax.lax.rsqrt(var + eps)
    gamma = params["gamma"].astype(jnp.float32)
    beta = params["beta"].astype(jnp.float32)
    mean_c = jnp.repeat(mean, cg, axis=1)                            # (B, C)
    rstd_c = jnp.repeat(rstd, cg, axis=1)                            # (B, C)
    scale_c = (rstd_c * gamma[None, :]).reshape(B, 1, C)
    shift_c = (beta[None, :] - mean_c * rstd_c * gamma[None, :]).reshape(B, 1, C)

    # ---- layout: (B, C, H, W) -> (B, HW, C) in the INPUT dtype (no f32 upcast
    # -> half the HBM traffic for bf16 models); pad HW up to a tile multiple.
    x = jnp.transpose(x_nchw.reshape(B, C, HW), (0, 2, 1))           # (B, HW, C)
    t = max(8, min(int(tile), _round_up(HW, 8)))
    t = (t // 8) * 8                                                 # sublane align
    hw_pad = _round_up(HW, t)
    if hw_pad != HW:
        x = jnp.pad(x, ((0, 0), (0, hw_pad - HW), (0, 0)))
    nq = hw_pad // t
    nk = hw_pad // t

    # ---- weights: torch conv1x1 weight is (Cout, Cin) -> transpose so the
    # kernel does xn @ W; cast to bf16 for native MXU rate; fold softmax scale.
    sm_scale = float(C) ** (-0.5)
    wq = (params["wq"].T.astype(jnp.float32) * sm_scale).astype(jnp.bfloat16)
    bq = (params["bq"].astype(jnp.float32) * sm_scale).reshape(1, C)
    wk = params["wk"].T.astype(jnp.bfloat16)
    bk = params["bk"].astype(jnp.float32).reshape(1, C)
    wv = params["wv"].T.astype(jnp.bfloat16)
    bv = params["bv"].astype(jnp.float32).reshape(1, C)
    wp = params["wp"].T.astype(jnp.bfloat16)
    bp = params["bp"].astype(jnp.float32).reshape(1, C)

    kernel = functools.partial(attn_block_kernel, hw=HW, tk=t,
                               mask_kv=(hw_pad != HW))

    single = pl.Buffered(1)   # constant operands: drop the dead second buffer
    const = lambda shape: pl.BlockSpec(shape, lambda b, qi, ki: (0,) * len(shape),
                                       pipeline_mode=single)

    out = pl.pallas_call(
        kernel,
        out_shape=jax.ShapeDtypeStruct((B, hw_pad, C), x_nchw.dtype),
        grid_spec=pltpu.PrefetchScalarGridSpec(
            num_scalar_prefetch=0,
            grid=(B, nq, nk),
            in_specs=[
                # x, q view: index is ki-invariant -> one DMA per (b, qi).
                pl.BlockSpec((1, t, C), lambda b, qi, ki: (b, qi, 0)),
                # x, kv view: consumed only on the qi == 0 sweep; afterwards the
                # index is pinned to block 0 so the pipeline elides the re-DMA.
                pl.BlockSpec((1, t, C),
                             lambda b, qi, ki: (b, jnp.where(qi == 0, ki, 0), 0)),
                pl.BlockSpec((1, 1, C), lambda b, qi, ki: (b, 0, 0)),    # GN scale
                pl.BlockSpec((1, 1, C), lambda b, qi, ki: (b, 0, 0)),    # GN shift
                const((C, C)), const((1, C)),   # wq, bq
                const((C, C)), const((1, C)),   # wk, bk
                const((C, C)), const((1, C)),   # wv, bv
                const((C, C)), const((1, C)),   # wp, bp
            ],
            out_specs=pl.BlockSpec((1, t, C), lambda b, qi, ki: (b, qi, 0)),
            scratch_shapes=[
                pltpu.VMEM((t, C), jnp.bfloat16),        # q tile (scale pre-folded)
                pltpu.VMEM((t, 1), jnp.float32),         # running max m
                pltpu.VMEM((t, 1), jnp.float32),         # running sum l
                pltpu.VMEM((t, C), jnp.float32),         # unnormalized accumulator
                pltpu.VMEM((nk, t, C), jnp.bfloat16),    # projected K cache (per batch)
                pltpu.VMEM((nk, t, C), jnp.bfloat16),    # projected V cache (per batch)
            ]),
        compiler_params=pltpu.CompilerParams(
            # Only the batch axis is parallel: the K/V cache fill happens on the
            # qi == 0 sweep, so every q-tile of a batch must run on the same core.
            dimension_semantics=("parallel", "arbitrary", "arbitrary"),
            vmem_limit_bytes=_vmem_limit_bytes()),
    )(x, x, scale_c, shift_c, wq, bq, wk, bk, wv, bv, wp, bp)

    out = out[:, :HW, :]
    # (B, HW, C) -> (B, C, H, W)
    return jnp.transpose(out, (0, 2, 1)).reshape(B, C, H, W).astype(x_nchw.dtype)


def attn_block_ref(x, params, *, num_groups=NUM_GROUPS, eps=GN_EPS):
    """Pure-JAX f32 reference mirroring the PyTorch forward (for verification)."""
    B, C, H, W = x.shape
    G = num_groups
    cg = C // G
    xg = x.reshape(B, G, cg, H, W)
    mean = xg.mean(axis=(2, 3, 4), keepdims=True)
    var = xg.var(axis=(2, 3, 4), keepdims=True)
    xn = ((xg - mean) / jnp.sqrt(var + eps)).reshape(B, C, H, W)
    xn = xn * params["gamma"][None, :, None, None] + params["beta"][None, :, None, None]

    def conv1x1(z, w, b):
        return jnp.einsum("bchw,oc->bohw", z, w) + b[None, :, None, None]

    q = conv1x1(xn, params["wq"], params["bq"])
    k = conv1x1(xn, params["wk"], params["bk"])
    v = conv1x1(xn, params["wv"], params["bv"])
    HW = H * W
    q = jnp.transpose(q.reshape(B, C, HW), (0, 2, 1))
    k = k.reshape(B, C, HW)
    v = v.reshape(B, C, HW)
    qk = jnp.einsum("bic,bcj->bij", q, k) * (float(C) ** (-0.5))
    p = jax.nn.softmax(qk, axis=-1)
    attn = jnp.einsum("bcj,bij->bci", v, p).reshape(B, C, H, W)
    return conv1x1(attn, params["wp"], params["bp"]) + x


def make_params(key, C):
    keys = jax.random.split(key, 10)
    f = lambda k, shape, s=0.1: (s * jax.random.normal(k, shape)).astype(jnp.float32)
    return {
        "gamma": 1.0 + f(keys[0], (C,)),
        "beta": f(keys[1], (C,)),
        "wq": f(keys[2], (C, C)), "bq": f(keys[3], (C,)),
        "wk": f(keys[4], (C, C)), "bk": f(keys[5], (C,)),
        "wv": f(keys[6], (C, C)), "bv": f(keys[7], (C,)),
        "wp": f(keys[8], (C, C)), "bp": f(keys[9], (C,)),
    }


if __name__ == "__main__":
    B, C, H, W = 2, 128, 8, 8   # C multiple of NUM_GROUPS (and lane-aligned)
    key = jax.random.PRNGKey(0)
    kx, kp = jax.random.split(key)
    x = jax.random.normal(kx, (B, C, H, W), dtype=jnp.float32)
    params = make_params(kp, C)
    ref = attn_block_ref(x, params)

    # tile=32 -> 2x2 tiles: exercises online softmax + the K/V cache fill/reuse.
    out = jax.block_until_ready(attn_block_pallas(x, params, tile=32))
    assert out.shape == (B, C, H, W)
    max_err = float(jnp.max(jnp.abs(out - ref)))
    rel_err = float(jnp.linalg.norm(out - ref) / jnp.linalg.norm(ref))
    # bf16 MXU operands vs. an all-f32 reference -> tolerance in the bf16 regime.
    assert max_err < 1.5e-1 and rel_err < 3e-2, \
        f"tile=32: max abs err {max_err}, rel err {rel_err}"

    # tile=48 -> HW (64) padded to 96: exercises the kv masking path.
    out2 = jax.block_until_ready(attn_block_pallas(x, params, tile=48))
    max_err2 = float(jnp.max(jnp.abs(out2 - ref)))
    rel_err2 = float(jnp.linalg.norm(out2 - ref) / jnp.linalg.norm(ref))
    assert max_err2 < 1.5e-1 and rel_err2 < 3e-2, \
        f"tile=48: max abs err {max_err2}, rel err {rel_err2}"

    print("KERNEL_OK")
</pallas_src>

<mosaic_0001>
module attributes {stable_mosaic.version = 11 : i64} {
  func.func @attn_block_kernel(%arg0: i32, %arg1: i32, %arg2: i32, %arg3: memref<1x32x128xf32, #tpu.memory_space<vmem>>, %arg4: memref<1x32x128xf32, #tpu.memory_space<vmem>>, %arg5: memref<1x1x128xf32, #tpu.memory_space<vmem>>, %arg6: memref<1x1x128xf32, #tpu.memory_space<vmem>>, %arg7: memref<128x128xbf16, #tpu.memory_space<vmem>>, %arg8: memref<1x128xf32, #tpu.memory_space<vmem>>, %arg9: memref<128x128xbf16, #tpu.memory_space<vmem>>, %arg10: memref<1x128xf32, #tpu.memory_space<vmem>>, %arg11: memref<128x128xbf16, #tpu.memory_space<vmem>>, %arg12: memref<1x128xf32, #tpu.memory_space<vmem>>, %arg13: memref<128x128xbf16, #tpu.memory_space<vmem>>, %arg14: memref<1x128xf32, #tpu.memory_space<vmem>>, %arg15: memref<1x32x128xf32, #tpu.memory_space<vmem>>, %arg16: memref<32x128xbf16, #tpu.memory_space<vmem>>, %arg17: memref<32x1xf32, #tpu.memory_space<vmem>>, %arg18: memref<32x1xf32, #tpu.memory_space<vmem>>, %arg19: memref<32x128xf32, #tpu.memory_space<vmem>>, %arg20: memref<2x32x128xbf16, #tpu.memory_space<vmem>>, %arg21: memref<2x32x128xbf16, #tpu.memory_space<vmem>>) attributes {dimension_semantics = [#tpu.dimension_semantics<parallel>, #tpu.dimension_semantics<arbitrary>, #tpu.dimension_semantics<arbitrary>], iteration_bounds = array<i64: 2, 2, 2>, scalar_prefetch = 0 : i64, scratch_operands = 6 : i64, tpu.core_type = #tpu.core_type<tc>, window_params = [{transform_indices = @transform_0, window_bounds = array<i64: 1, 32, 128>}, {transform_indices = @transform_1, window_bounds = array<i64: 1, 32, 128>}, {transform_indices = @transform_2, window_bounds = array<i64: 1, 1, 128>}, {transform_indices = @transform_3, window_bounds = array<i64: 1, 1, 128>}, {pipeline_mode = #tpu.pipeline_mode<synchronous>, transform_indices = @transform_4, window_bounds = array<i64: 128, 128>}, {pipeline_mode = #tpu.pipeline_mode<synchronous>, transform_indices = @transform_5, window_bounds = array<i64: 1, 128>}, {pipeline_mode = #tpu.pipeline_mode<synchronous>, transform_indices = @transform_6, window_bounds = array<i64: 128, 128>}, {pipeline_mode = #tpu.pipeline_mode<synchronous>, transform_indices = @transform_7, window_bounds = array<i64: 1, 128>}, {pipeline_mode = #tpu.pipeline_mode<synchronous>, transform_indices = @transform_8, window_bounds = array<i64: 128, 128>}, {pipeline_mode = #tpu.pipeline_mode<synchronous>, transform_indices = @transform_9, window_bounds = array<i64: 1, 128>}, {pipeline_mode = #tpu.pipeline_mode<synchronous>, transform_indices = @transform_10, window_bounds = array<i64: 128, 128>}, {pipeline_mode = #tpu.pipeline_mode<synchronous>, transform_indices = @transform_11, window_bounds = array<i64: 1, 128>}, {transform_indices = @transform_12, window_bounds = array<i64: 1, 32, 128>}]} {
    %c0 = arith.constant 0 : index
    %c0_0 = arith.constant 0 : index
    %c0_1 = arith.constant 0 : index
    %0 = vector.load %arg5[%c0, %c0_0, %c0_1] : memref<1x1x128xf32, #tpu.memory_space<vmem>>, vector<1x1x128xf32>
    %1 = vector.shape_cast %0 : vector<1x1x128xf32> to vector<1x128xf32>
    %c0_2 = arith.constant 0 : index
    %c0_3 = arith.constant 0 : index
    %c0_4 = arith.constant 0 : index
    %2 = vector.load %arg6[%c0_2, %c0_3, %c0_4] : memref<1x1x128xf32, #tpu.memory_space<vmem>>, vector<1x1x128xf32>
    %3 = vector.shape_cast %2 : vector<1x1x128xf32> to vector<1x128xf32>
    %c0_i32 = arith.constant 0 : i32
    %4 = arith.cmpi eq, %arg2, %c0_i32 : i32
    %5 = arith.extui %4 : i1 to i32
    %c0_i32_5 = arith.constant 0 : i32
    %6 = arith.cmpi ne, %5, %c0_i32_5 : i32
    scf.if %6 {
      %c0_30 = arith.constant 0 : index
      %c0_31 = arith.constant 0 : index
      %c0_32 = arith.constant 0 : index
      %44 = vector.load %arg3[%c0_30, %c0_31, %c0_32] : memref<1x32x128xf32, #tpu.memory_space<vmem>>, vector<1x32x128xf32>
      %45 = vector.shape_cast %44 : vector<1x32x128xf32> to vector<32x128xf32>
      %46 = vector.broadcast %1 : vector<1x128xf32> to vector<32x128xf32>
      %47 = arith.mulf %45, %46 : vector<32x128xf32>
      %48 = vector.broadcast %3 : vector<1x128xf32> to vector<32x128xf32>
      %49 = arith.addf %47, %48 : vector<32x128xf32>
      %50 = arith.truncf %49 : vector<32x128xf32> to vector<32x128xbf16>
      %c0_33 = arith.constant 0 : index
      %c0_34 = arith.constant 0 : index
      %51 = vector.load %arg7[%c0_33, %c0_34] : memref<128x128xbf16, #tpu.memory_space<vmem>>, vector<128x128xbf16>
      %cst_35 = arith.constant dense<0.000000e+00> : vector<32x128xf32>
      %52 = tpu.matmul %50, %51, %cst_35 {dimension_numbers = #tpu.dot_dimension_numbers<[1], [0], [0], [1], [0, 0, 1, 1], [], []>} : vector<32x128xbf16>, vector<128x128xbf16>, vector<32x128xf32> -> vector<32x128xf32>
      %c0_36 = arith.constant 0 : index
      %c0_37 = arith.constant 0 : index
      %53 = vector.load %arg8[%c0_36, %c0_37] : memref<1x128xf32, #tpu.memory_space<vmem>>, vector<1x128xf32>
      %54 = vector.broadcast %53 : vector<1x128xf32> to vector<32x128xf32>
      %55 = arith.addf %52, %54 : vector<32x128xf32>
      %56 = arith.truncf %55 : vector<32x128xf32> to vector<32x128xbf16>
      %c0_38 = arith.constant 0 : index
      %c0_39 = arith.constant 0 : index
      %57 = vector.load %arg16[%c0_38, %c0_39] : memref<32x128xbf16, #tpu.memory_space<vmem>>, vector<32x128xbf16>
      tpu.vector_store %arg16[%c0_38, %c0_39], %56 {strides = array<i32>} : memref<32x128xbf16, #tpu.memory_space<vmem>>, vector<32x128xbf16>,
      %cst_40 = arith.constant 0xFF800000 : f32
      %58 = vector.broadcast %cst_40 : f32 to vector<32x1xf32>
      %c0_41 = arith.constant 0 : index
      %c0_42 = arith.constant 0 : index
      %59 = vector.load %arg17[%c0_41, %c0_42] : memref<32x1xf32, #tpu.memory_space<vmem>>, vector<32x1xf32>
      tpu.vector_store %arg17[%c0_41, %c0_42], %58 {strides = array<i32>} : memref<32x1xf32, #tpu.memory_space<vmem>>, vector<32x1xf32>,
      %cst_43 = arith.constant 0.000000e+00 : f32
      %60 = vector.broadcast %cst_43 : f32 to vector<32x1xf32>
      %c0_44 = arith.constant 0 : index
      %c0_45 = arith.constant 0 : index
      %61 = vector.load %arg18[%c0_44, %c0_45] : memref<32x1xf32, #tpu.memory_space<vmem>>, vector<32x1xf32>
      tpu.vector_store %arg18[%c0_44, %c0_45], %60 {strides = array<i32>} : memref<32x1xf32, #tpu.memory_space<vmem>>, vector<32x1xf32>,
      %cst_46 = arith.constant 0.000000e+00 : f32
      %62 = vector.broadcast %cst_46 : f32 to vector<32x128xf32>
      %c0_47 = arith.constant 0 : index
      %c0_48 = arith.constant 0 : index
      %63 = vector.load %arg19[%c0_47, %c0_48] : memref<32x128xf32, #tpu.memory_space<vmem>>, vector<32x128xf32>
      tpu.vector_store %arg19[%c0_47, %c0_48], %62 {strides = array<i32>} : memref<32x128xf32, #tpu.memory_space<vmem>>, vector<32x128xf32>,
    } else {
    }
    %c0_i32_6 = arith.constant 0 : i32
    %7 = arith.cmpi eq, %arg1, %c0_i32_6 : i32
    %8 = arith.extui %7 : i1 to i32
    %c0_i32_7 = arith.constant 0 : i32
    %9 = arith.cmpi ne, %8, %c0_i32_7 : i32
    scf.if %9 {
      %c0_30 = arith.constant 0 : index
      %c0_31 = arith.constant 0 : index
      %c0_32 = arith.constant 0 : index
      %44 = vector.load %arg4[%c0_30, %c0_31, %c0_32] : memref<1x32x128xf32, #tpu.memory_space<vmem>>, vector<1x32x128xf32>
      %45 = vector.shape_cast %44 : vector<1x32x128xf32> to vector<32x128xf32>
      %46 = vector.broadcast %1 : vector<1x128xf32> to vector<32x128xf32>
      %47 = arith.mulf %45, %46 : vector<32x128xf32>
      %48 = vector.broadcast %3 : vector<1x128xf32> to vector<32x128xf32>
      %49 = arith.addf %47, %48 : vector<32x128xf32>
      %50 = arith.truncf %49 : vector<32x128xf32> to vector<32x128xbf16>
      %c0_33 = arith.constant 0 : index
      %c0_34 = arith.constant 0 : index
      %51 = vector.load %arg9[%c0_33, %c0_34] : memref<128x128xbf16, #tpu.memory_space<vmem>>, vector<128x128xbf16>
      %cst_35 = arith.constant dense<0.000000e+00> : vector<32x128xf32>
      %52 = tpu.matmul %50, %51, %cst_35 {dimension_numbers = #tpu.dot_dimension_numbers<[1], [0], [0], [1], [0, 0, 1, 1], [], []>} : vector<32x128xbf16>, vector<128x128xbf16>, vector<32x128xf32> -> vector<32x128xf32>
      %c0_36 = arith.constant 0 : index
      %c0_37 = arith.constant 0 : index
      %53 = vector.load %arg10[%c0_36, %c0_37] : memref<1x128xf32, #tpu.memory_space<vmem>>, vector<1x128xf32>
      %54 = vector.broadcast %53 : vector<1x128xf32> to vector<32x128xf32>
      %55 = arith.addf %52, %54 : vector<32x128xf32>
      %56 = arith.truncf %55 : vector<32x128xf32> to vector<32x128xbf16>
      %57 = arith.index_cast %arg2 : i32 to index
      %c0_38 = arith.constant 0 : index
      %c0_39 = arith.constant 0 : index
      %58 = vector.load %arg20[%57, %c0_38, %c0_39] : memref<2x32x128xbf16, #tpu.memory_space<vmem>>, vector<1x32x128xbf16>
      %59 = vector.shape_cast %58 : vector<1x32x128xbf16> to vector<32x128xbf16>
      %60 = vector.shape_cast %56 : vector<32x128xbf16> to vector<1x32x128xbf16>
      tpu.vector_store %arg20[%57, %c0_38, %c0_39], %60 {strides = array<i32>} : memref<2x32x128xbf16, #tpu.memory_space<vmem>>, vector<1x32x128xbf16>,
      %c0_40 = arith.constant 0 : index
      %c0_41 = arith.constant 0 : index
      %61 = vector.load %arg11[%c0_40, %c0_41] : memref<128x128xbf16, #tpu.memory_space<vmem>>, vector<128x128xbf16>
      %cst_42 = arith.constant dense<0.000000e+00> : vector<32x128xf32>
      %62 = tpu.matmul %50, %61, %cst_42 {dimension_numbers = #tpu.dot_dimension_numbers<[1], [0], [0], [1], [0, 0, 1, 1], [], []>} : vector<32x128xbf16>, vector<128x128xbf16>, vector<32x128xf32> -> vector<32x128xf32>
      %c0_43 = arith.constant 0 : index
      %c0_44 = arith.constant 0 : index
      %63 = vector.load %arg12[%c0_43, %c0_44] : memref<1x128xf32, #tpu.memory_space<vmem>>, vector<1x128xf32>
      %64 = vector.broadcast %63 : vector<1x128xf32> to vector<32x128xf32>
      %65 = arith.addf %62, %64 : vector<32x128xf32>
      %66 = arith.truncf %65 : vector<32x128xf32> to vector<32x128xbf16>
      %67 = arith.index_cast %arg2 : i32 to index
      %c0_45 = arith.constant 0 : index
      %c0_46 = arith.constant 0 : index
      %68 = vector.load %arg21[%67, %c0_45, %c0_46] : memref<2x32x128xbf16, #tpu.memory_space<vmem>>, vector<1x32x128xbf16>
      %69 = vector.shape_cast %68 : vector<1x32x128xbf16> to vector<32x128xbf16>
      %70 = vector.shape_cast %66 : vector<32x128xbf16> to vector<1x32x128xbf16>
      tpu.vector_store %arg21[%67, %c0_45, %c0_46], %70 {strides = array<i32>} : memref<2x32x128xbf16, #tpu.memory_space<vmem>>, vector<1x32x128xbf16>,
    } else {
    }
    %10 = arith.index_cast %arg2 : i32 to index
    %c0_8 = arith.constant 0 : index
    %c0_9 = arith.constant 0 : index
    %11 = vector.load %arg20[%10, %c0_8, %c0_9] : memref<2x32x128xbf16, #tpu.memory_space<vmem>>, vector<1x32x128xbf16>
    %12 = vector.shape_cast %11 : vector<1x32x128xbf16> to vector<32x128xbf16>
    %13 = arith.index_cast %arg2 : i32 to index
    %c0_10 = arith.constant 0 : index
    %c0_11 = arith.constant 0 : index
    %14 = vector.load %arg21[%13, %c0_10, %c0_11] : memref<2x32x128xbf16, #tpu.memory_space<vmem>>, vector<1x32x128xbf16>
    %15 = vector.shape_cast %14 : vector<1x32x128xbf16> to vector<32x128xbf16>
    %c0_12 = arith.constant 0 : index
    %c0_13 = arith.constant 0 : index
    %16 = vector.load %arg16[%c0_12, %c0_13] : memref<32x128xbf16, #tpu.memory_space<vmem>>, vector<32x128xbf16>
    %cst = arith.constant dense<0.000000e+00> : vector<32x32xf32>
    %17 = tpu.matmul %16, %12, %cst {dimension_numbers = #tpu.dot_dimension_numbers<[1], [1], [0], [0], [0, 0, 1, 0], [], []>} : vector<32x128xbf16>, vector<32x128xbf16>, vector<32x32xf32> -> vector<32x32xf32>
    %c0_14 = arith.constant 0 : index
    %c0_15 = arith.constant 0 : index
    %18 = vector.load %arg17[%c0_14, %c0_15] : memref<32x1xf32, #tpu.memory_space<vmem>>, vector<32x1xf32>
    %cst_16 = arith.constant dense<0xFF800000> : vector<32xf32>
    %19 = vector.multi_reduction <maximumf>, %17, %cst_16 [1] : vector<32x32xf32> to vector<32xf32>
    %20 = vector.shape_cast %19 : vector<32xf32> to vector<32x1xf32>
    %21 = arith.maximumf %18, %20 : vector<32x1xf32>
    %22 = arith.subf %18, %21 : vector<32x1xf32>
    %23 = math.exp %22 : vector<32x1xf32>
    %24 = vector.broadcast %21 : vector<32x1xf32> to vector<32x32xf32>
    %25 = arith.subf %17, %24 : vector<32x32xf32>
    %26 = math.exp %25 : vector<32x32xf32>
    %c0_17 = arith.constant 0 : index
    %c0_18 = arith.constant 0 : index
    %27 = vector.load %arg18[%c0_17, %c0_18] : memref<32x1xf32, #tpu.memory_space<vmem>>, vector<32x1xf32>
    %28 = arith.mulf %23, %27 : vector<32x1xf32>
    %cst_19 = arith.constant dense<0.000000e+00> : vector<32xf32>
    %29 = vector.multi_reduction <add>, %26, %cst_19 [1] : vector<32x32xf32> to vector<32xf32>
    %30 = vector.shape_cast %29 : vector<32xf32> to vector<32x1xf32>
    %31 = arith.addf %28, %30 : vector<32x1xf32>
    %c0_20 = arith.constant 0 : index
    %c0_21 = arith.constant 0 : index
    %32 = vector.load %arg18[%c0_20, %c0_21] : memref<32x1xf32, #tpu.memory_space<vmem>>, vector<32x1xf32>
    tpu.vector_store %arg18[%c0_20, %c0_21], %31 {strides = array<i32>} : memref<32x1xf32, #tpu.memory_space<vmem>>, vector<32x1xf32>,
    %c0_22 = arith.constant 0 : index
    %c0_23 = arith.constant 0 : index
    %33 = vector.load %arg19[%c0_22, %c0_23] : memref<32x128xf32, #tpu.memory_space<vmem>>, vector<32x128xf32>
    %34 = vector.broadcast %23 : vector<32x1xf32> to vector<32x128xf32>
    %35 = arith.mulf %34, %33 : vector<32x128xf32>
    %36 = arith.truncf %26 : vector<32x32xf32> to vector<32x32xbf16>
    %cst_24 = arith.constant dense<0.000000e+00> : vector<32x128xf32>
    %37 = tpu.matmul %36, %15, %cst_24 {dimension_numbers = #tpu.dot_dimension_numbers<[1], [0], [0], [1], [0, 0, 1, 1], [], []>} : vector<32x32xbf16>, vector<32x128xbf16>, vector<32x128xf32> -> vector<32x128xf32>
    %38 = arith.addf %35, %37 : vector<32x128xf32>
    %c0_25 = arith.constant 0 : index
    %c0_26 = arith.constant 0 : index
    %39 = vector.load %arg19[%c0_25, %c0_26] : memref<32x128xf32, #tpu.memory_space<vmem>>, vector<32x128xf32>
    tpu.vector_store %arg19[%c0_25, %c0_26], %38 {strides = array<i32>} : memref<32x128xf32, #tpu.memory_space<vmem>>, vector<32x128xf32>,
    %c0_27 = arith.constant 0 : index
    %c0_28 = arith.constant 0 : index
    %40 = vector.load %arg17[%c0_27, %c0_28] : memref<32x1xf32, #tpu.memory_space<vmem>>, vector<32x1xf32>
    tpu.vector_store %arg17[%c0_27, %c0_28], %21 {strides = array<i32>} : memref<32x1xf32, #tpu.memory_space<vmem>>, vector<32x1xf32>,
    %c1_i32 = arith.constant 1 : i32
    %41 = arith.cmpi eq, %arg2, %c1_i32 : i32
    %42 = arith.extui %41 : i1 to i32
    %c0_i32_29 = arith.constant 0 : i32
    %43 = arith.cmpi ne, %42, %c0_i32_29 : i32
    scf.if %43 {
      %c0_30 = arith.constant 0 : index
      %c0_31 = arith.constant 0 : index
      %44 = vector.load %arg19[%c0_30, %c0_31] : memref<32x128xf32, #tpu.memory_space<vmem>>, vector<32x128xf32>
      %c0_32 = arith.constant 0 : index
      %c0_33 = arith.constant 0 : index
      %45 = vector.load %arg18[%c0_32, %c0_33] : memref<32x1xf32, #tpu.memory_space<vmem>>, vector<32x1xf32>
      %46 = tpu.reciprocal %45 {approx = true} : vector<32x1xf32> -> vector<32x1xf32>
      %47 = vector.broadcast %46 : vector<32x1xf32> to vector<32x128xf32>
      %48 = arith.mulf %44, %47 : vector<32x128xf32>
      %49 = arith.truncf %48 : vector<32x128xf32> to vector<32x128xbf16>
      %c0_34 = arith.constant 0 : index
      %c0_35 = arith.constant 0 : index
      %50 = vector.load %arg13[%c0_34, %c0_35] : memref<128x128xbf16, #tpu.memory_space<vmem>>, vector<128x128xbf16>
      %cst_36 = arith.constant dense<0.000000e+00> : vector<32x128xf32>
      %51 = tpu.matmul %49, %50, %cst_36 {dimension_numbers = #tpu.dot_dimension_numbers<[1], [0], [0], [1], [0, 0, 1, 1], [], []>} : vector<32x128xbf16>, vector<128x128xbf16>, vector<32x128xf32> -> vector<32x128xf32>
      %c0_37 = arith.constant 0 : index
      %c0_38 = arith.constant 0 : index
      %52 = vector.load %arg14[%c0_37, %c0_38] : memref<1x128xf32, #tpu.memory_space<vmem>>, vector<1x128xf32>
      %53 = vector.broadcast %52 : vector<1x128xf32> to vector<32x128xf32>
      %54 = arith.addf %51, %53 : vector<32x128xf32>
      %c0_39 = arith.constant 0 : index
      %c0_40 = arith.constant 0 : index
      %c0_41 = arith.constant 0 : index
      %55 = vector.load %arg3[%c0_39, %c0_40, %c0_41] : memref<1x32x128xf32, #tpu.memory_space<vmem>>, vector<1x32x128xf32>
      %56 = vector.shape_cast %55 : vector<1x32x128xf32> to vector<32x128xf32>
      %57 = arith.addf %54, %56 : vector<32x128xf32>
      %c0_42 = arith.constant 0 : index
      %c0_43 = arith.constant 0 : index
      %c0_44 = arith.constant 0 : index
      %58 = vector.load %arg15[%c0_42, %c0_43, %c0_44] : memref<1x32x128xf32, #tpu.memory_space<vmem>>, vector<1x32x128xf32>
      %59 = vector.shape_cast %58 : vector<1x32x128xf32> to vector<32x128xf32>
      %60 = vector.shape_cast %57 : vector<32x128xf32> to vector<1x32x128xf32>
      tpu.vector_store %arg15[%c0_42, %c0_43, %c0_44], %60 {strides = array<i32>} : memref<1x32x128xf32, #tpu.memory_space<vmem>>, vector<1x32x128xf32>,
    } else {
    }
    return
  }
  func.func @transform_0(%arg0: i32, %arg1: i32, %arg2: i32) -> (i32, i32, i32) {
    %c0_i32 = arith.constant 0 : i32
    %c0_i32_0 = arith.constant 0 : i32
    return %arg0, %arg1, %c0_i32 : i32, i32, i32
  }
  func.func @transform_1(%arg0: i32, %arg1: i32, %arg2: i32) -> (i32, i32, i32) {
    %c0_i32 = arith.constant 0 : i32
    %0 = arith.cmpi eq, %arg1, %c0_i32 : i32
    %c0_i32_0 = arith.constant 0 : i32
    %1 = arith.select %0, %arg2, %c0_i32_0 : i32
    %c0_i32_1 = arith.constant 0 : i32
    %c0_i32_2 = arith.constant 0 : i32
    return %arg0, %1, %c0_i32_1 : i32, i32, i32
  }
  func.func @transform_2(%arg0: i32, %arg1: i32, %arg2: i32) -> (i32, i32, i32) {
    %c0_i32 = arith.constant 0 : i32
    %c0_i32_0 = arith.constant 0 : i32
    %c0_i32_1 = arith.constant 0 : i32
    return %arg0, %c0_i32, %c0_i32_0 : i32, i32, i32
  }
  func.func @transform_3(%arg0: i32, %arg1: i32, %arg2: i32) -> (i32, i32, i32) {
    %c0_i32 = arith.constant 0 : i32
    %c0_i32_0 = arith.constant 0 : i32
    %c0_i32_1 = arith.constant 0 : i32
    return %arg0, %c0_i32, %c0_i32_0 : i32, i32, i32
  }
  func.func @transform_4(%arg0: i32, %arg1: i32, %arg2: i32) -> (i32, i32) {
    %c0_i32 = arith.constant 0 : i32
    %c0_i32_0 = arith.constant 0 : i32
    %c0_i32_1 = arith.constant 0 : i32
    return %c0_i32, %c0_i32_0 : i32, i32
  }
  func.func @transform_5(%arg0: i32, %arg1: i32, %arg2: i32) -> (i32, i32) {
    %c0_i32 = arith.constant 0 : i32
    %c0_i32_0 = arith.constant 0 : i32
    %c0_i32_1 = arith.constant 0 : i32
    return %c0_i32, %c0_i32_0 : i32, i32
  }
  func.func @transform_6(%arg0: i32, %arg1: i32, %arg2: i32) -> (i32, i32) {
    %c0_i32 = arith.constant 0 : i32
    %c0_i32_0 = arith.constant 0 : i32
    %c0_i32_1 = arith.constant 0 : i32
    return %c0_i32, %c0_i32_0 : i32, i32
  }
  func.func @transform_7(%arg0: i32, %arg1: i32, %arg2: i32) -> (i32, i32) {
    %c0_i32 = arith.constant 0 : i32
    %c0_i32_0 = arith.constant 0 : i32
    %c0_i32_1 = arith.constant 0 : i32
    return %c0_i32, %c0_i32_0 : i32, i32
  }
  func.func @transform_8(%arg0: i32, %arg1: i32, %arg2: i32) -> (i32, i32) {
    %c0_i32 = arith.constant 0 : i32
    %c0_i32_0 = arith.constant 0 : i32
    %c0_i32_1 = arith.constant 0 : i32
    return %c0_i32, %c0_i32_0 : i32, i32
  }
  func.func @transform_9(%arg0: i32, %arg1: i32, %arg2: i32) -> (i32, i32) {
    %c0_i32 = arith.constant 0 : i32
    %c0_i32_0 = arith.constant 0 : i32
    %c0_i32_1 = arith.constant 0 : i32
    return %c0_i32, %c0_i32_0 : i32, i32
  }
  func.func @transform_10(%arg0: i32, %arg1: i32, %arg2: i32) -> (i32, i32) {
    %c0_i32 = arith.constant 0 : i32
    %c0_i32_0 = arith.constant 0 : i32
    %c0_i32_1 = arith.constant 0 : i32
    return %c0_i32, %c0_i32_0 : i32, i32
  }
  func.func @transform_11(%arg0: i32, %arg1: i32, %arg2: i32) -> (i32, i32) {
    %c0_i32 = arith.constant 0 : i32
    %c0_i32_0 = arith.constant 0 : i32
    %c0_i32_1 = arith.constant 0 : i32
    return %c0_i32, %c0_i32_0 : i32, i32
  }
  func.func @transform_12(%arg0: i32, %arg1: i32, %arg2: i32) -> (i32, i32, i32) {
    %c0_i32 = arith.constant 0 : i32
    %c0_i32_0 = arith.constant 0 : i32
    return %arg0, %arg1, %c0_i32 : i32, i32, i32
  }
}

</mosaic_0001>

<bundles_post_ra>
// kernel: tpu_custom_call.1
= control target key start
LH: loop header
LB: loop body
LE: loop exit
PB: predicated region body
PF: predicated region fallthrough
CT: control target
= control target key end

     0   :  { %s3042_s0 = inlined_call_operand.hbm [shape: f32[2,64,128], index: 0, kind: input, shape index: {}]   ;;  %s3043_s1 = inlined_call_operand.hbm [shape: f32[2,64,128], index: 1, kind: input, shape index: {}]   ;;  %s3044_s2 = inlined_call_operand.hbm [shape: f32[2,1,128], index: 2, kind: input, shape index: {}]   ;;  %s3045_s3 = inlined_call_operand.vmem [shape: f32[2,1,128], index: 3, kind: input, shape index: {}]   ;;  %s3046_s4 = inlined_call_operand.hbm [shape: bf16[128,128], index: 4, kind: input, shape index: {}]   ;;  %s3047_s5 = inlined_call_operand.vmem [shape: f32[1,128], index: 5, kind: input, shape index: {}]   ;;  %s3048_s6 = inlined_call_operand.hbm [shape: bf16[128,128], index: 6, kind: input, shape index: {}]   ;;  %s3049_s7 = inlined_call_operand.vmem [shape: f32[1,128], index: 7, kind: input, shape index: {}]   ;;  %s3050_s8 = inlined_call_operand.hbm [shape: bf16[128,128], index: 8, kind: input, shape index: {}]   ;;  %s3051_s9 = inlined_call_operand.vmem [shape: f32[1,128], index: 9, kind: input, shape index: {}]   ;;  %s3052_s10 = inlined_call_operand.hbm [shape: bf16[128,128], index: 10, kind: input, shape index: {}]   ;;  %s3053_s11 = inlined_call_operand.vmem [shape: f32[1,128], index: 11, kind: input, shape index: {}]   ;;  %s3054_s12 = inlined_call_operand.hbm [shape: f32[2,64,128], index: 12, kind: output, shape index: {}]  }
   0x1   :  { %3077 = sst [smem:[#allocation44_spill]] %s3042_s0 }
   0x2   :  { %3078 = sst [smem:[#allocation45_spill]] %s3043_s1 }
   0x3   :  { %3079 = sst [smem:[#allocation46_spill]] %s3044_s2 }
   0x4   :  { %3080 = sst [smem:[#allocation47_spill]] %s3045_s3 }
   0x5   :  { %3081 = sst [smem:[#allocation48_spill]] %s3046_s4 }
   0x6   :  { %3082 = sst [smem:[#allocation49_spill]] %s3047_s5 }
   0x7   :  { %3083 = sst [smem:[#allocation50_spill]] %s3048_s6 }
   0x8   :  { %3084 = sst [smem:[#allocation51_spill]] %s3049_s7 }
   0x9   :  { %3085 = sst [smem:[#allocation52_spill]] %s3050_s8 }
   0xa   :  { %3086 = sst [smem:[#allocation53_spill]] %s3051_s9 }
   0xb   :  { %3087 = sst [smem:[#allocation54_spill]] %s3052_s10 }
   0xc   :  { %3088 = sst [smem:[#allocation55_spill]] %s3053_s11 }
   0xd   :  { %3089 = sst [smem:[#allocation56_spill]] %s3054_s12 }
   0xe   :  { %17 = vsyncpa [#allocation9], 0 }
   0xf   :  { %19 = vsyncpa [#allocation9 + $0x1], 0 }
  0x10   :  { %20 = vsyncpa [#allocation12], 0 }
  0x11   :  { %22 = vsyncpa [#allocation12 + $0x1], 0 }
  0x12   :  { %23 = vsyncpa [#allocation15], 0 }
  0x13   :  { %24 = vsyncpa [#allocation18], 0 }
  0x14   :  { %25 = vsyncpa [#allocation10], 0 }
  0x15   :  { %27 = vsyncpa [#allocation10 + $0x1], 0  ;;  %s2576_s21 = smov 0   ;;  %s2578_s22 = smov 0  }
  0x16   :  { %s2580_s23 = smov 0   ;;  %s2582_s24 = smov 0  }
  0x17   :  { %s2584_s25 = smov 0   ;;  %s2586_s26 = smov 0  }
  0x18   :  { %s2588_s27 = smov 0   ;;  %s2590_s28 = smov 0  }
  0x19   :  { %s2592_s29 = smov 0   ;;  %s2594_s30 = smov 0  }
  0x1a   :  { %s2596_s13 = smov 0   ;;  %s2598_s14 = smov 0  }
  0x1b   :  { %s2600_s15 = smov 0   ;;  %s2602_s16 = smov 0  }
  0x1c   :  { %s2604_s17 = smov 0   ;;  %s2606_s18 = smov 0  }
  0x1d LB: > { %3090 = sst [smem:[#allocation27_spill]] %s2435_s21  ;;  %s2657_s19 = sadd.s32 4294967295, %s2495_s18   ;;  %s2495_s18 = sphi %s2606_s18, %s33_s18   ;;  %s2491_s17 = sphi %s2604_s17, %s3170_s17   ;;  %s2487_s16 = sphi %s2602_s16, %s3159_s16   ;;  %s2483_s15 = sphi %s2600_s15, %s3169_s15   ;;  %s2479_s14 = sphi %s2598_s14, %s3168_s14   ;;  %s2475_s13 = sphi %s2596_s13, %s3157_s13   ;;  %s2471_s30 = sphi %s2594_s30, %s3156_s30   ;;  %s2467_s29 = sphi %s2592_s29, %s3155_s29   ;;  %s2463_s28 = sphi %s2590_s28, %s3167_s28   ;;  %s2459_s27 = sphi %s2588_s27, %s3166_s27   ;;  %s2455_s26 = sphi %s2586_s26, %s3165_s26   ;;  %s2451_s25 = sphi %s2584_s25, %s3164_s25   ;;  %s2447_s24 = sphi %s2582_s24, %s3153_s24   ;;  %s2443_s23 = sphi %s2580_s23, %s3163_s23   ;;  %s2439_s22 = sphi %s2578_s22, %s3162_s22   ;;  %s2435_s21 = sphi %s2576_s21, %s3151_s21  }
  0x1e   : > { %3091 = sst [smem:[#allocation28_spill]] %s2439_s22  ;;  %p1569_p0 = scmp.ge.s32.totalorder %s2495_s18, 1 }
  0x1f   : > { %3092 = sst [smem:[#allocation29_spill]] %s2443_s23  ;;  %p75_p1 = scmp.eq.s32.totalorder %s2657_s19, 0 }
  0x20   : > { %3093 = sst [smem:[#allocation30_spill]] %s2451_s25  ;;  %p365_p2 = scmp.lt.s32.totalorder %s2495_s18, 9 }
  0x21   : > { %3094 = sst [smem:[#allocation31_spill]] %s2467_s29  ;;  %s2497_s7 = smov [#allocation14]  }
  0x22   : > { %3095 = sst [smem:[#allocation32_spill]] %s2471_s30  ;;  %p2665_p3 = pnand %p1569_p0, %p365_p2 }
  0x23   : > { %3096 = sst [smem:[#allocation33_spill]] %s2475_s13  ;;  %s378_s13 = sshll.u32 %s2497_s7, 4  ;;  %s379_s13 = int_to_ptr.vmem [resolvable:$true] %s378_s13 }
  0x24   : > { %3097 = sst [smem:[#allocation34_spill]] %s2479_s14  ;;  %p1895_p4 = pneg %p2665_p3 }
  0x25   : > { %3098 = sst [smem:[#allocation35_spill]] %s2483_s15  ;;  %s3058_s30 = smov 64  }
  0x26   : > { %3099 = sst [smem:[#allocation36_spill]] %s2487_s16  ;;  %p2673_p5 = pnand %p1895_p4, %p75_p1 }
  0x27   : > { %s3100_s4 = sld [smem:[#allocation48_spill]]  ;;  %s3060_s3 = smov 4  }
  0x28   : > { %s3101_s9 = scalar_select %p2665_p3, 1, 0 }
  0x29   : > { %s3104_s8 = sld [smem:[#allocation52_spill]]  ;;  %s2500_s7 = smov [#allocation17]  }
  0x2a   : > { %3102 = sst [smem:[#allocation37_spill]] %s3101_s9  ;;  %s45_s20 = sadd.s32 1, %s2483_s15 }
  0x2b   : > { %p46_p6 = scmp.ge.s32.totalorder %s45_s20, 2  ;;  %s52_s14 = sadd.s32 1, %s2491_s17 }
  0x2c   : > { %p69_p7 = scmp.eq.s32.totalorder %s2495_s18, 0  ;;  %p84_p8 = scmp.eq.s32.totalorder %s2487_s16, 0 }
  0x2d   : > { %s376_s11 = sshll.u32 %s3100_s4, 4  ;;  %s412_s4 = sshll.u32 %s2500_s7, 4  ;;  %s377_s11 = int_to_ptr.hbm [resolvable:$true] %s376_s11  ;;  %s413_s4 = int_to_ptr.vmem [resolvable:$true] %s412_s4 }
  0x2e   : > { %1898 = dma.hbm_to_vmem [thread:$0]  (!%p2673_p5), %s377_s11, 1024, %s379_s13, [#allocation15], %s3058_s30, %s3058_s30, %s3060_s3  }
  0x2f   : > { %s410_s5 = sshll.u32 %s3104_s8, 4  ;;  %s48_s8 = sadd.s32 1, %s2487_s16  ;;  %s411_s5 = int_to_ptr.hbm [resolvable:$true] %s410_s5 }
  0x30   : > { %1904 = dma.hbm_to_vmem [thread:$0]  (!%p2673_p5), %s411_s5, 1024, %s413_s4, [#allocation18], %s3058_s30, %s3058_s30, %s3060_s3  }
  0x31   : > { %s3172_s20 = smov (%p46_p6, %s45_s20), 0  ;;  %s3174_s8 = smov (!%p46_p6, %s48_s8), %s2487_s16 }
  0x32   : > { %3105 = sst [smem:[#allocation38_spill]] %s3172_s20  ;;  %p50_p9 = scmp.ge.s32.totalorder %s3174_s8, 2 }
  0x33   : > { %s85_s11 = scalar_select %p84_p8, %s2483_s15, 0 }
  0x34   : > { %s93_s13 = sadd.s32 1, %s2455_s26  ;;  %p100_p10 = scmp.ne.s32.totalorder %s2455_s26, %s2451_s25 }
  0x35   : > { %p106_p11 = scmp.ne.s32.totalorder %s2451_s25, %s2447_s24  ;;  %s3176_s8 = smov (%p50_p9, %s3174_s8), 0 }
  0x36   : > { %3106 = sst [smem:[#allocation39_spill]] %s3176_s8  ;;  %s3178_s14 = smov (!%p50_p9, %s52_s14), %s2491_s17 }
  0x37   : > { %s57_s5 = ssub.s32 %s2487_s16, %s3176_s8  ;;  %p86_p12 = scmp.eq.s32.totalorder %s3176_s8, 0 }
  0x38   : > { %p54_p13 = scmp.ge.s32.totalorder %s3178_s14, 2  ;;  %p2712_p0 = por %p100_p10, %p69_p7 }
  0x39   : > { %s87_s4 = scalar_select %p86_p12, %s3172_s20, 0 }
  0x3a   : > { %s3180_s14 = smov (%p54_p13, %s3178_s14), 0  ;;  %p2721_p2 = por %p106_p11, %p75_p1 }
  0x3b   : > { %3108 = sst [smem:[#allocation40_spill]] %s3180_s14  ;;  %s89_s24 = ssub.s32 %s85_s11, %s87_s4 }
  0x3c   : > { %s3109_s30 = scalar_select %p2721_p2, 1, 0 }
  0x3d   : > { %s2727_s3 = ssub.s32 %s2491_s17, %s3180_s14  ;;  %p1926_p4 = scmp.lt.s32.totalorder %s2495_s18, 8 }
  0x3e   : > { %3110 = sst [smem:[#allocation41_spill]] %s3109_s30  ;;  %s2731_s8 = sor.u32 %s57_s5, %s2727_s3 }
  0x3f   : > { %3111 = sst [smem:[#allocation42_spill]] %s2727_s3  ;;  %s90_s15 = sor.u32 %s89_s24, %s2727_s3 }
  0x40   : > { %p59_p6 = scmp.eq.s32.totalorder %s2731_s8, 0  ;;  %p91_p8 = scmp.eq.s32.totalorder %s90_s15, 0 }
  0x41   : > { %s1577_s20 = sshll.u32 %s2491_s17, 3  ;;  %s470_s25 = sand.u32 1, %s2495_s18  }
  0x42   : > { %s2737_s4 = scalar_select %p91_p8, %s2455_s26, %s93_s13  }
  0x43   : > { %s472_s9 = sand.u32 1, %s2455_s26   ;;  %s1580_s30 = sshll.u32 %s85_s11, 2 }
  0x44   : > { %s1579_s2 = sshll.u32 %s472_s9, 5  ;;  %s481_s14 = sadd.s32 %s1580_s30, %s1577_s20 }
  0x45   : > { %s1582_s0 = sshll.u32 %s481_s14, 3  ;;  %s474_s21 = scalar_lea.vmem [#allocation11], %s1579_s2 }
  0x46   : > { %s486_s22 = sshll.u32 %s474_s21, 4  ;;  %s3112_s1 = sld [smem:[#allocation45_spill]]  ;;  %s487_s22 = int_to_ptr.vmem [resolvable:$true] %s486_s22 }
  0x47   : > { %p1912_p9 = pnand %p1926_p4, %p2712_p0  ;;  %s3113_s6 = sld [smem:[#allocation50_spill]] }
  0x48   : > { %s2753_s2 = scalar_lea.sflag [#allocation12], %s470_s25  ;;  %s3074_s21 = smov 8  }
  0x49   : > { %s3114_s10 = sld [smem:[#allocation54_spill]]  ;;  %s2503_s25 = smov [#allocation16]  }
  0x4a   : > { %s395_s11 = sshll.u32 %s2503_s25, 4  ;;  %s3115_s7 = smov 4   ;;  %s396_s11 = int_to_ptr.vmem [resolvable:$true] %s395_s11 }
  0x4b   : > { %s3116_s5 = smov 64   ;;  %s61_s15 = sadd.s32 1, %s2467_s29 }
  0x4c   : > { %s483_s24 = scalar_lea.hbm %s3112_s1, %s1582_s0  ;;  %s3073_s0 = smov 128  }
  0x4d   : > { %s484_s3 = sshll.u32 %s483_s24, 4  ;;  %s393_s9 = sshll.u32 %s3113_s6, 4  ;;  %s485_s3 = int_to_ptr.hbm [resolvable:$true] %s484_s3  ;;  %s394_s9 = int_to_ptr.hbm [resolvable:$true] %s393_s9 }
  0x4e   : > { %1914 = dma.hbm_to_vmem [thread:$0]  (!%p1912_p9), %s485_s3, 512, %s487_s22, %s2753_s2, %s3073_s0, %s3073_s0, %s3074_s21  }
  0x4f   : > { %s427_s14 = sshll.u32 %s3114_s10, 4  ;;  %s2504_s24 = smov [#allocation19]   ;;  %s428_s14 = int_to_ptr.hbm [resolvable:$true] %s427_s14 }
  0x50   : > { %1901 = dma.hbm_to_vmem [thread:$0]  (!%p2673_p5), %s394_s9, 1024, %s396_s11, [#allocation15], %s3116_s5, %s3116_s5, %s3115_s7  }
  0x51   : > { %s429_s3 = sshll.u32 %s2504_s24, 4  ;;  %s1568_s22 = sadd.s32 4294967294, %s2495_s18   ;;  %s430_s3 = int_to_ptr.vmem [resolvable:$true] %s429_s3 }
  0x52   : > { %1907 = dma.hbm_to_vmem [thread:$0]  (!%p2673_p5), %s428_s14, 1024, %s430_s3, [#allocation18], %s3116_s5, %s3116_s5, %s3115_s7  }
  0x53   : > { %s2777_s13 = scalar_select %p59_p6, %s2467_s29, %s61_s15  }
  0x54   : > { %p68_p10 = scmp.ne.s32.totalorder %s2467_s29, %s2463_s28  ;;  %p74_p11 = scmp.ne.s32.totalorder %s2463_s28, %s2459_s27 }
  0x55   : > { %3117 = sst [smem:[#allocation43_spill]] %s2777_s13  ;;  %p352_p12 = scmp.eq.s32.totalorder %s2657_s19, 7 }
  0x56   : > { %p358_p13 = scmp.eq.s32.totalorder %s1568_s22, 7  ;;  %p2786_p0 = por %p69_p7, %p68_p10 }
  0x57   : > { %p2792_p8 = por %p75_p1, %p74_p11  ;;  %p2796_p5 = por %p352_p12, %p68_p10 }
  0x58   : > { %s3121_s23 = sld [smem:[#allocation42_spill]]  ;;  %p2800_p6 = por %p358_p13, %p74_p11 }
  0x59   : > { %s3123_s14 = sld [smem:[#allocation29_spill]]  ;;  %s446_s25 = sand.u32 1, %s2467_s29  }
  0x5a   : > { %s3122_s30 = scalar_select %p2800_p6, 1, 0 }
  0x5b   : > { %s3124_s11 = sld [smem:[#allocation28_spill]]  ;;  %s1576_s7 = sshll.u32 %s2487_s16, 2 }
  0x5c   : > { %s3125_s5 = sld [smem:[#allocation27_spill]]  ;;  %s1575_s24 = sshll.u32 %s446_s25, 5 }
  0x5d   : > { %s455_s3 = sadd.s32 %s1577_s20, %s1576_s7  ;;  %s450_s15 = scalar_lea.vmem [#allocation8], %s1575_s24 }
  0x5e   : > { %s1578_s22 = sshll.u32 %s455_s3, 3  ;;  %s460_s0 = sshll.u32 %s450_s15, 4  ;;  %s461_s0 = int_to_ptr.vmem [resolvable:$true] %s460_s0 }
  0x5f   : > { %s3126_s6 = sld [smem:[#allocation44_spill]]  ;;  %p1909_p9 = pnand %p1926_p4, %p2786_p0 }
  0x60   : > { %s447_s16 = scalar_lea.sflag [#allocation9], %s446_s25  ;;  %s3127_s29 = smov 8  }
  0x61   : > { %s3128_s20 = smov 128   ;;  %p117_p10 = scmp.eq.s32.totalorder %s3121_s23, 0 }
  0x62   : > { %s119_s7 = sadd.s32 1, %s3123_s14  ;;  %p126_p11 = scmp.ne.s32.totalorder %s3123_s14, %s3124_s11 }
  0x63   : > { %p132_p12 = scmp.ne.s32.totalorder %s3124_s11, %s3125_s5  ;;  %s3130_s25 = sld [smem:[#allocation46_spill]] }
  0x64   : > { %s2825_s1 = scalar_select %p117_p10, %s3123_s14, %s119_s7  }
  0x65   : > { %s457_s10 = scalar_lea.hbm %s3126_s6, %s1578_s22  ;;  %p128_p13 = por %p126_p11, %p69_p7 }
  0x66   : > { %s458_s13 = sshll.u32 %s457_s10, 4  ;;  %p2831_p6 = por %p132_p12, %p75_p1  ;;  %s459_s13 = int_to_ptr.hbm [resolvable:$true] %s458_s13 }
  0x67   : > { %1911 = dma.hbm_to_vmem [thread:$0]  (!%p1909_p9), %s459_s13, 512, %s461_s0, %s447_s16, %s3128_s20, %s3128_s20, %s3127_s29  }
  0x68   : > { %s498_s10 = sand.u32 1, %s3123_s14   ;;  %p1915_p0 = pnand %p1926_p4, %p128_p13 }
  0x69   : > { %s502_s24 = scalar_lea.hbm %s3130_s25, %s2491_s17  ;;  %s499_s16 = scalar_lea.vmem [#allocation13], %s498_s10 }
  0x6a   : > { %s504_s29 = sshll.u32 %s502_s24, 4  ;;  %s506_s0 = sshll.u32 %s499_s16, 4  ;;  %s505_s29 = int_to_ptr.hbm [resolvable:$true] %s504_s29  ;;  %s507_s0 = int_to_ptr.vmem [resolvable:$true] %s506_s0 }
  0x6b   : > { %1917 = dma.hbm_to_vmem [thread:$0]  (!%p1915_p0), %s505_s29, 16, %s507_s0, %s2753_s2  }
  0x6c   : > { %521 = sbr.rel (%p2665_p3) target bundleno = 1357 (0x54d), region = 68  ;;  %s2846_s23 = sand.u32 (!%p2665_p3), 1, %s2463_s28  }
  0x6d   : > { %s1584_s14 = sshll.u32 (!%p2665_p3), %s2846_s23, 5  ;;  %s524_s11 = scalar_lea.sflag (!%p2665_p3), [#allocation9], %s2846_s23 }
  0x6e   : > { %s2850_s5 = scalar_lea.vmem (!%p2665_p3), [#allocation8], %s1584_s14 }
  0x71   : > { %2410 = dma.done.wait (%p2792_p8), %s524_s11, 512  }
  0x72   : > { %2412 = vsyncadd (%p2792_p8), %s524_s11, 4294966784  ;;  %s3132_s2 = sld [smem:[#allocation30_spill]]  ;;  %s533_s22 = sand.u32 1, %s2657_s19  }
  0x73   : > { %s534_s7 = scalar_lea.sflag [#allocation12], %s533_s22 }
  0x78   : > { %s535_s15 = sand.u32 1, %s3132_s2  }
  0x79   : > { %s1585_s20 = sshll.u32 %s535_s15, 5 }
  0x7a   : > { %s2858_s10 = scalar_lea.vmem [#allocation11], %s1585_s20 }
  0x7b   : > { %2414 = dma.done.wait (%p2721_p2), %s534_s7, 512  }
  0x7c   : > { %2416 = vsyncadd (%p2721_p2), %s534_s7, 4294966784  ;;  %s3134_s21 = sld [smem:[#allocation28_spill]] }
  0x82   : > { %s545_s9 = sand.u32 1, %s3134_s21  }
  0x83   : > { %s546_s25 = scalar_lea.vmem [#allocation13], %s545_s9 }
  0x84   : > { %2418 = dma.done.wait (%p2831_p6), %s534_s7, 16  }
  0x85   : > { %2420 = vsyncadd (%p2831_p6), %s534_s7, 4294967280 }
  0x86   : > { %2422 = dma.done.wait (%p75_p1), [#allocation15], 2048  }
  0x87   : > { %2424 = vsyncadd (%p75_p1), [#allocation15], 4294965248 }
  0x88   : > { %2426 = dma.done.wait (%p75_p1), [#allocation18], 2048  }
  0x89   : > { %2428 = vsyncadd (%p75_p1), [#allocation18], 4294965248  ;;  %s3135_s12 = sld [smem:[#allocation34_spill]]  ;;  %v2882_v0 = vld [vmem:[%s546_s25] sm:$0x1]  ;;  %s2886_s0 = scalar_lea.vmem [#allocation20], %s1584_s14 }
  0x8a   : > { %s3136_s6 = sld [smem:[#allocation47_spill]] }
  0x8b   : > { %s3137_s13 = sld [smem:[#allocation32_spill]] }
  0x8f   : > { %p624_p3 = scmp.lt.s32.totalorder %s3135_s12, 1 }
  0x91   : > { %s3182_s12 = smov (!%p624_p3, %s3135_s12), 1  ;;  %p1591_p7 = scmp.ne.s32.totalorder %s3137_s13, 0 }
  0x92   : > { %s626_s16 = scalar_lea.vmem %s3136_s6, %s3182_s12  ;;  %s3138_s11 = sld [smem:[#allocation49_spill]] (!%p1591_p7) }
  0x93   : > { %v2884_v1 = vld [vmem:[%s626_s16] sm:$0x1]  ;;  %634 = sbr.rel (%p1591_p7) target bundleno = 324 (0x144), region = 100 }
  0x98   : > { %v1767_v2 = vld [vmem:[#allocation14 + $0x38] sm:$0xff]  ;;  %v1766_v3 = vld [vmem:[#allocation14 + $0x30] sm:$0xff]  ;;  %v1765_v4 = vld [vmem:[#allocation14 + $0x28] sm:$0xff]  ;;  %v640_v9 = vperm.slane %v2882_v0, 0  ;;  %v647_v13 = vperm.slane %v2884_v1, 0  ;;  %vm750_vm0 = vcmask 7168  }
  0x99   : > { %723 = vmatpush.bf16.msra.mxu0 %v1767_v2  ;;  %1835 = vmatpush.bf16.msra.mxu1 %v1767_v2  ;;  %v1764_v5 = vld [vmem:[#allocation14 + $0x20] sm:$0xff]  ;;  %v1763_v6 = vld [vmem:[#allocation14 + $0x18] sm:$0xff]  ;;  %v1762_v7 = vld [vmem:[#allocation14 + $0x10] sm:$0xff]  ;;  %v2505_v26 = vmov -inf   ;;  %v2506_v27 = vmov 0.0  }
  0x9a   : > { %v635_v8 = vld [vmem:[%s2850_s5] sm:$0xff]  ;;  %v636_v10 = vld [vmem:[%s2850_s5 + $0x8] sm:$0xff]  ;;  %v637_v11 = vld [vmem:[%s2850_s5 + $0x10] sm:$0xff]  ;;  %751 = vst.msk [vmem:[#allocation3] sm:$0xff] %vm750_vm0, %v2505_v26 }
  0x9b   : > { %v638_v12 = vld [vmem:[%s2850_s5 + $0x18] sm:$0xff]  ;;  %v642_v14 = vmul.f32 %v640_v9, %v635_v8  ;;  %v643_v15 = vmul.f32 %v640_v9, %v636_v10  ;;  %v644_v16 = vmul.f32 %v640_v9, %v637_v11  ;;  %v1761_v18 = vld [vmem:[#allocation14 + $0x8] sm:$0xff]  ;;  %v1760_v23 = vld [vmem:[#allocation14] sm:$0xff]  ;;  %752 = vst.msk [vmem:[#allocation3 + $0x8] sm:$0xff] %vm750_vm0, %v2505_v26 }
  0x9c   : > { %v645_v17 = vmul.f32 %v640_v9, %v638_v12  ;;  %753 = vst.msk [vmem:[#allocation3 + $0x10] sm:$0xff] %vm750_vm0, %v2505_v26  ;;  %v2074_v30 = vld [vmem:[%s3138_s11] ss:$0 sm:$0xff] }
  0x9d   : > { %724 = vmatpush.bf16.msra.mxu0 %v1766_v3  ;;  %1836 = vmatpush.bf16.msra.mxu1 %v1766_v3  ;;  %v649_v19 = vadd.f32 %v647_v13, %v642_v14  ;;  %v650_v20 = vadd.f32 %v647_v13, %v643_v15  ;;  %v651_v21 = vadd.f32 %v647_v13, %v644_v16 }
  0x9e   : > { %v652_v22 = vadd.f32 %v647_v13, %v645_v17  ;;  %754 = vst.msk [vmem:[#allocation3 + $0x18] sm:$0xff] %vm750_vm0, %v2505_v26 }
  0x9f   : > { %v653_v24 = vpack.c.bf16 %v650_v20, %v649_v19  ;;  %755 = vst.msk [vmem:[#allocation4] sm:$0xff] %vm750_vm0, %v2506_v27 }
  0xa0   : > { %v654_v25 = vpack.c.bf16 %v652_v22, %v651_v21  ;;  %756 = vst.msk [vmem:[#allocation4 + $0x8] sm:$0xff] %vm750_vm0, %v2506_v27 }
  0xa1   : > { %725 = vmatpush.bf16.msra.mxu0 %v1765_v4  ;;  %1837 = vmatpush.bf16.msra.mxu1 %v1765_v4  ;;  %757 = vst.msk [vmem:[#allocation4 + $0x10] sm:$0xff] %vm750_vm0, %v2506_v27 }
  0xa2   : > { %758 = vst.msk [vmem:[#allocation4 + $0x18] sm:$0xff] %vm750_vm0, %v2506_v27 }
  0xa3   : > { %759 = vst [vmem:[#allocation5 + $0x8] sm:$0xff] %v2506_v27 }
  0xa4   : > { %760 = vst [vmem:[#allocation5 + $0x10] sm:$0xff] %v2506_v27 }
  0xa5   : > { %726 = vmatpush.bf16.msra.mxu0 %v1764_v5  ;;  %1838 = vmatpush.bf16.msra.mxu1 %v1764_v5  ;;  %761 = vst [vmem:[#allocation5] sm:$0xff] %v2506_v27 }
  0xa6   : > { %762 = vst [vmem:[#allocation5 + $0x18] sm:$0xff] %v2506_v27 }
  0xa9   : > { %727 = vmatpush.bf16.msra.mxu0 %v1763_v6  ;;  %1839 = vmatpush.bf16.msra.mxu1 %v1763_v6 }
  0xad   : > { %728 = vmatpush.bf16.msra.mxu0 %v1762_v7  ;;  %1840 = vmatpush.bf16.msra.mxu1 %v1762_v7 }
  0xb1   : > { %729 = vmatpush.bf16.msra.mxu0 %v1761_v18  ;;  %1841 = vmatpush.bf16.msra.mxu1 %v1761_v18 }
  0xb5   : > { %730 = vmatpush.bf16.msra.mxu0 %v1760_v23  ;;  %1842 = vmatpush.bf16.msra.mxu1 %v1760_v23 }
  0xb8   : > { %731 = vmatmul.bf16.vlgmr.msra.gmra.mxu0 %v653_v24  ;;  %736 = vmatmul.bf16.vlgmr.msra.gmra.mxu1 %v654_v25 }
 0x135   : > { %v732_v28 = vpop.f32.mrf.mxu0  ;;  %v737_v29 = vpop.f32.mrf.mxu1 }
 0x136   : > { %v733_v33 = vadd.f32 %v2074_v30, %v732_v28  ;;  %v738_v34 = vadd.f32 %v2074_v30, %v737_v29 }
 0x13d   : > { %v734_v31 = vpop.f32.mrf.mxu0  ;;  %v739_v32 = vpop.f32.mrf.mxu1 }
 0x13e   : > { %v735_v35 = vadd.f32 %v2074_v30, %v734_v31  ;;  %v740_v36 = vadd.f32 %v2074_v30, %v739_v32 }
 0x140   : > { %v1805_v37 = vpack.c.bf16 %v735_v35, %v733_v33  ;;  %v1810_v38 = vpack.c.bf16 %v740_v36, %v738_v34 }
 0x142   : > { %1806 = vst [vmem:[#allocation2] sm:$0xff] %v1805_v37  }
 0x143   : > { %1832 = vst [vmem:[#allocation2 + $0x8] sm:$0xff] %v1810_v38  }
 0x144 PF: > { %s3139_s2 = sld [smem:[#allocation33_spill]] }
 0x14a   : > { %p1624_p1 = scmp.ne.s32.totalorder %s3139_s2, 0 }
 0x14b   : > { %s3140_s3 = sld [smem:[#allocation32_spill]] (!%p1624_p1) }
 0x14c   : > { %766 = sbr.rel (%p1624_p1) target bundleno = 515 (0x203), region = 104  ;;  %s3141_s20 = sld [smem:[#allocation51_spill]] (!%p1624_p1) }
 0x14d   : > { %s3142_s21 = sld [smem:[#allocation53_spill]] (!%p1624_p1) }
 0x151   : > { %v1775_v39 = vld [vmem:[#allocation16 + $0x38] sm:$0xff]  ;;  %v1774_v41 = vld [vmem:[#allocation16 + $0x30] sm:$0xff]  ;;  %v1773_v43 = vld [vmem:[#allocation16 + $0x28] sm:$0xff]  ;;  %v772_v51 = vperm.slane %v2882_v0, 0  ;;  %v779_v56 = vperm.slane %v2884_v1, 0  ;;  %s1776_s9 = sshll.u32 %s3140_s3, 4 }
 0x152   : > { %v1784_v40 = vld [vmem:[#allocation17 + $0x38] sm:$0xff]  ;;  %855 = vmatpush.bf16.msra.mxu0 %v1775_v39  ;;  %1843 = vmatpush.bf16.msra.mxu2 %v1775_v39  ;;  %v1783_v42 = vld [vmem:[#allocation17 + $0x30] sm:$0xff]  ;;  %v1782_v44 = vld [vmem:[#allocation17 + $0x28] sm:$0xff]  ;;  %s880_s25 = scalar_lea.vmem [#allocation6], %s1776_s9  ;;  %s977_s12 = scalar_lea.vmem [#allocation7], %s1776_s9 }
 0x153   : > { %953 = vmatpush.bf16.msra.mxu1 %v1784_v40  ;;  %1851 = vmatpush.bf16.msra.mxu3 %v1784_v40  ;;  %v1772_v45 = vld [vmem:[#allocation16 + $0x20] sm:$0xff]  ;;  %v1771_v47 = vld [vmem:[#allocation16 + $0x18] sm:$0xff]  ;;  %v1770_v49 = vld [vmem:[#allocation16 + $0x10] sm:$0xff] }
 0x154   : > { %v1781_v46 = vld [vmem:[#allocation17 + $0x20] sm:$0xff]  ;;  %v1780_v48 = vld [vmem:[#allocation17 + $0x18] sm:$0xff]  ;;  %v769_v53 = vld [vmem:[%s2858_s10 + $0x10] sm:$0xff] }
 0x155   : > { %v767_v50 = vld [vmem:[%s2858_s10] sm:$0xff]  ;;  %v768_v52 = vld [vmem:[%s2858_s10 + $0x8] sm:$0xff]  ;;  %v770_v54 = vld [vmem:[%s2858_s10 + $0x18] sm:$0xff]  ;;  %v776_v59 = vmul.f32 %v772_v51, %v769_v53 }
 0x156   : > { %856 = vmatpush.bf16.msra.mxu0 %v1774_v41  ;;  %1844 = vmatpush.bf16.msra.mxu2 %v1774_v41  ;;  %v1779_v55 = vld [vmem:[#allocation17 + $0x10] sm:$0xff]  ;;  %v774_v57 = vmul.f32 %v772_v51, %v767_v50  ;;  %v775_v58 = vmul.f32 %v772_v51, %v768_v52  ;;  %v777_v60 = vmul.f32 %v772_v51, %v770_v54  ;;  %v1769_v61 = vld [vmem:[#allocation16 + $0x8] sm:$0xff]  ;;  %v1768_v4 = vld [vmem:[#allocation16] sm:$0xff] }
 0x157   : > { %954 = vmatpush.bf16.msra.mxu1 %v1783_v42  ;;  %1852 = vmatpush.bf16.msra.mxu3 %v1783_v42  ;;  %v1778_v62 = vld [vmem:[#allocation17 + $0x8] sm:$0xff]  ;;  %v783_v2 = vadd.f32 %v779_v56, %v776_v59  ;;  %v1777_v1 = vld [vmem:[#allocation17] sm:$0xff] }
 0x158   : > { %v781_v63 = vadd.f32 %v779_v56, %v774_v57  ;;  %v782_v0 = vadd.f32 %v779_v56, %v775_v58  ;;  %v784_v3 = vadd.f32 %v779_v56, %v777_v60  ;;  %v2075_v9 = vld [vmem:[%s3141_s20] ss:$0 sm:$0xff] }
 0x159   : > { %v2076_v10 = vld [vmem:[%s3142_s21] ss:$0 sm:$0xff] }
 0x15a   : > { %857 = vmatpush.bf16.msra.mxu0 %v1773_v43  ;;  %1845 = vmatpush.bf16.msra.mxu2 %v1773_v43  ;;  %v785_v5 = vpack.c.bf16 %v782_v0, %v781_v63  ;;  %v786_v6 = vpack.c.bf16 %v784_v3, %v783_v2 }
 0x15b   : > { %955 = vmatpush.bf16.msra.mxu1 %v1782_v44  ;;  %1853 = vmatpush.bf16.msra.mxu3 %v1782_v44 }
 0x15e   : > { %858 = vmatpush.bf16.msra.mxu0 %v1772_v45  ;;  %1846 = vmatpush.bf16.msra.mxu2 %v1772_v45 }
 0x15f   : > { %956 = vmatpush.bf16.msra.mxu1 %v1781_v46  ;;  %1854 = vmatpush.bf16.msra.mxu3 %v1781_v46 }
 0x162   : > { %859 = vmatpush.bf16.msra.mxu0 %v1771_v47  ;;  %1847 = vmatpush.bf16.msra.mxu2 %v1771_v47 }
 0x163   : > { %957 = vmatpush.bf16.msra.mxu1 %v1780_v48  ;;  %1855 = vmatpush.bf16.msra.mxu3 %v1780_v48 }
 0x166   : > { %860 = vmatpush.bf16.msra.mxu0 %v1770_v49  ;;  %1848 = vmatpush.bf16.msra.mxu2 %v1770_v49 }
 0x167   : > { %958 = vmatpush.bf16.msra.mxu1 %v1779_v55  ;;  %1856 = vmatpush.bf16.msra.mxu3 %v1779_v55 }
 0x16a   : > { %861 = vmatpush.bf16.msra.mxu0 %v1769_v61  ;;  %1849 = vmatpush.bf16.msra.mxu2 %v1769_v61 }
 0x16b   : > { %959 = vmatpush.bf16.msra.mxu1 %v1778_v62  ;;  %1857 = vmatpush.bf16.msra.mxu3 %v1778_v62 }
 0x16e   : > { %862 = vmatpush.bf16.msra.mxu0 %v1768_v4  ;;  %1850 = vmatpush.bf16.msra.mxu2 %v1768_v4 }
 0x16f   : > { %960 = vmatpush.bf16.msra.mxu1 %v1777_v1  ;;  %1858 = vmatpush.bf16.msra.mxu3 %v1777_v1 }
 0x171   : > { %863 = vmatmul.bf16.vlgmr.msra.gmra.mxu0 %v785_v5  ;;  %868 = vmatmul.bf16.vlgmr.msra.gmra.mxu2 %v786_v6 }
 0x172   : > { %961 = vmatmul.bf16.vlgmr.msra.gmra.mxu1 %v785_v5  ;;  %966 = vmatmul.bf16.vlgmr.msra.gmra.mxu3 %v786_v6 }
 0x1ee   : > { %v864_v7 = vpop.f32.mrf.mxu0 }
 0x1ef   : > { %v962_v8 = vpop.f32.mrf.mxu1  ;;  %v865_v14 = vadd.f32 %v2075_v9, %v864_v7 }
 0x1f0   : > { %v963_v17 = vadd.f32 %v2076_v10, %v962_v8 }
 0x1f4   : > { %v869_v11 = vpop.f32.mrf.mxu2 }
 0x1f5   : > { %v967_v12 = vpop.f32.mrf.mxu3  ;;  %v870_v22 = vadd.f32 %v2075_v9, %v869_v11 }
 0x1f6   : > { %v866_v13 = vpop.f32.mrf.mxu0  ;;  %v968_v25 = vadd.f32 %v2076_v10, %v967_v12 }
 0x1f7   : > { %v867_v15 = vadd.f32 %v2075_v9, %v866_v13  ;;  %v964_v16 = vpop.f32.mrf.mxu1 }
 0x1f8   : > { %v965_v18 = vadd.f32 %v2076_v10, %v964_v16 }
 0x1f9   : > { %v1815_v19 = vpack.c.bf16 %v867_v15, %v865_v14 }
 0x1fa   : > { %v1825_v20 = vpack.c.bf16 %v965_v18, %v963_v17 }
 0x1fb   : > { %1816 = vst [vmem:[%s880_s25] sm:$0xff] %v1815_v19  }
 0x1fc   : > { %1826 = vst [vmem:[%s977_s12] sm:$0xff] %v1825_v20   ;;  %v871_v21 = vpop.f32.mrf.mxu2 }
 0x1fd   : > { %v872_v23 = vadd.f32 %v2075_v9, %v871_v21  ;;  %v969_v24 = vpop.f32.mrf.mxu3 }
 0x1fe   : > { %v970_v26 = vadd.f32 %v2076_v10, %v969_v24 }
 0x1ff   : > { %v1820_v27 = vpack.c.bf16 %v872_v23, %v870_v22 }
 0x200   : > { %v1830_v28 = vpack.c.bf16 %v970_v26, %v968_v25 }
 0x201   : > { %1833 = vst [vmem:[%s880_s25 + $0x8] sm:$0xff] %v1820_v27  }
 0x202   : > { %1834 = vst [vmem:[%s977_s12 + $0x8] sm:$0xff] %v1830_v28  }
 0x203 PF: > { %s3143_s24 = sld [smem:[#allocation32_spill]]  ;;  %v1792_v31 = vld [vmem:[#allocation2] sm:$0xff]  ;;  %v1793_v32 = vld [vmem:[#allocation2 + $0x8] sm:$0xff]  ;;  %vm1046_vm1 = vcmask 261120   ;;  %v2507_v41 = vmov 0   ;;  %v1042_v42 = vld [vmem:[#allocation3] sm:$0xff] }
 0x204   : > { %2078 = vset.pattern.permute.xlu0 %v2507_v41  ;;  %2077 = vset.pattern.permute.xlu2 %v2507_v41  ;;  %vm1131_vm2 = vcmask 7168   ;;  %v1044_v46 = vld [vmem:[#allocation3 + $0x10] sm:$0xff]  ;;  %v1043_v48 = vld [vmem:[#allocation3 + $0x8] sm:$0xff]  ;;  %v1045_v56 = vld [vmem:[#allocation3 + $0x18] sm:$0xff] }
 0x205   : > { %2079 = vset.pattern.permute.xlu1 %v2507_v41 }
 0x209   : > { %s1786_s29 = sshll.u32 %s3143_s24, 4  ;;  %p1721_p2 = scmp.ne.s32.totalorder %s3143_s24, 1 }
 0x20a   : > { %s984_s6 = scalar_lea.vmem [#allocation6], %s1786_s29  ;;  %s990_s16 = scalar_lea.vmem [#allocation7], %s1786_s29 }
 0x20b   : > { %v1788_v29 = vld [vmem:[%s984_s6 + $0x8] sm:$0xff]  ;;  %v1787_v30 = vld [vmem:[%s984_s6] sm:$0xff]  ;;  %s3144_s14 = sld [smem:[#allocation55_spill]] (!%p1721_p2) }
 0x20c   : > { %1029 = vmatpush.bf16.xpose.msra.mxu0 %v1788_v29  ;;  %1859 = vmatpush.bf16.xpose.msra.mxu2 %v1788_v29  ;;  %v1791_v3 = vld [vmem:[%s990_s16 + $0x8] sm:$0xff]  ;;  %v1790_v4 = vld [vmem:[%s990_s16] sm:$0xff] }
 0x20d   : > { %1861 = vmatpush.bf16.msra.mxu3 %v1791_v3  ;;  %1190 = vmatpush.bf16.msra.mxu1 %v1791_v3  ;;  %v1109_v29 = vld [vmem:[#allocation4 + $0x10] sm:$0xff] }
 0x211   : > { %1862 = vmatpush.bf16.msra.mxu3 %v1790_v4  ;;  %1191 = vmatpush.bf16.msra.mxu1 %v1790_v4 }
 0x214   : > { %1030 = vmatpush.bf16.xpose.msra.mxu0 %v1787_v30  ;;  %1860 = vmatpush.bf16.xpose.msra.mxu2 %v1787_v30 }
 0x21b   : > { %1031 = vmatmul.bf16.vlgmr.msra.gmra.mxu0 %v1792_v31  ;;  %1036 = vmatmul.bf16.vlgmr.msra.gmra.mxu2 %v1793_v32 }
 0x298   : > { %v2915_v33 = vpop.f32.mrf.mxu0 }
 0x299   : > { %v1047_v34 = vsel %vm1046_vm1, %v2915_v33, -inf }
 0x29a   : > { %1048 = vmax.xlane.f32.xlu1 %v1047_v34  ;;  %v1110_v34 = vld [vmem:[#allocation4 + $0x18] sm:$0xff] }
 0x29e   : > { %v2919_v35 = vpop.f32.mrf.mxu2 }
 0x29f   : > { %v1053_v36 = vsel %vm1046_vm1, %v2919_v35, -inf }
 0x2a0   : > { %1054 = vmax.xlane.f32.xlu0 %v1053_v36  ;;  %v2923_v37 = vpop.f32.mrf.mxu0 }
 0x2a1   : > { %v1050_v38 = vsel %vm1046_vm1, %v2923_v37, -inf }
 0x2a2   : > { %1051 = vmax.xlane.f32.xlu1 %v1050_v38  ;;  %v1107_v38 = vld [vmem:[#allocation4] sm:$0xff] }
 0x2a6   : > { %v1039_v39 = vpop.f32.mrf.mxu2 }
 0x2a7   : > { %v1056_v40 = vsel %vm1046_vm1, %v1039_v39, -inf }
 0x2a8   : > { %1057 = vmax.xlane.f32.xlu0 %v1056_v40 }
 0x30d   : > { %v1049_v43 = vpop.xlane.xlu1 %1048 }
 0x30e   : > { %v1059_v44 = vmax.f32 %v1042_v42, %v1049_v43  ;;  %v1108_v43 = vld [vmem:[#allocation4 + $0x8] sm:$0xff] }
 0x310   : > { %1211 = vst.msk [vmem:[#allocation3] sm:$0xff] %vm1131_vm2, %v1059_v44  ;;  %1077 = vperm.xlu0 %2078, %v1059_v44   ;;  %v1063_v45 = vsub.f32 %v1042_v42, %v1059_v44  ;;  %v1138_v42 = vld [vmem:[#allocation5] sm:$0xff] }
 0x312   : > { %v1067_v50 = vmul.f32 1.442695, %v1063_v45 }
 0x313   : > { %v1055_v47 = vpop.xlane.xlu0 %1054 }
 0x314   : > { %v1061_v49 = vmax.f32 %v1044_v46, %v1055_v47  ;;  %2080 = vpow2.f32 %v1067_v50  ;;  %v1139_v50 = vld [vmem:[#allocation5 + $0x18] sm:$0xff] }
 0x315   : > { %v1052_v51 = vpop.xlane.xlu1 %1051 }
 0x316   : > { %v1065_v52 = vsub.f32 %v1044_v46, %v1061_v49  ;;  %1213 = vst.msk [vmem:[#allocation3 + $0x10] sm:$0xff] %vm1131_vm2, %v1061_v49  ;;  %v1060_v53 = vmax.f32 %v1043_v48, %v1052_v51  ;;  %1087 = vperm.xlu2 %2077, %v1061_v49  }
 0x318   : > { %v1071_v54 = vmul.f32 1.442695, %v1065_v52  ;;  %1212 = vst.msk [vmem:[#allocation3 + $0x8] sm:$0xff] %vm1131_vm2, %v1060_v53  ;;  %1082 = vperm.xlu1 %2079, %v1060_v53   ;;  %v1064_v55 = vsub.f32 %v1043_v48, %v1060_v53  ;;  %v1136_v52 = vld [vmem:[#allocation5 + $0x8] sm:$0xff] }
 0x31a   : > { %2082 = vpow2.f32 %v1071_v54  ;;  %v1069_v59 = vmul.f32 1.442695, %v1064_v55  ;;  %v2932_v60 = vpop.eup %2080 }
 0x31b   : > { %v1058_v57 = vpop.xlane.xlu0 %1057 }
 0x31c   : > { %v1062_v58 = vmax.f32 %v1045_v56, %v1058_v57  ;;  %2084 = vpow2.f32 %v1069_v59 }
 0x31e   : > { %1214 = vst.msk [vmem:[#allocation3 + $0x18] sm:$0xff] %vm1131_vm2, %v1062_v58  ;;  %1092 = vperm.xlu2 %2077, %v1062_v58   ;;  %v1066_v62 = vsub.f32 %v1045_v56, %v1062_v58  ;;  %v1137_v58 = vld [vmem:[#allocation5 + $0x10] sm:$0xff] }
 0x320   : > { %v2083_v61 = vpop.eup %2082  ;;  %1142 = vperm.xlu1 %2079, %v2932_v60   ;;  %v1073_v63 = vmul.f32 1.442695, %v1066_v62 }
 0x321   : > { %1152 = vperm.xlu0 %2078, %v2083_v61   ;;  %v1113_v30 = vmul.f32 %v2083_v61, %v1109_v29 }
 0x322   : > { %v2935_v0 = vpop.eup %2084  ;;  %2086 = vpow2.f32 %v1073_v63 }
 0x323   : > { %v1112_v46 = vmul.f32 %v2935_v0, %v1108_v43 }
 0x328   : > { %1147 = vperm.xlu1 %2079, %v2935_v0   ;;  %v2087_v2 = vpop.eup %2086 }
 0x330   : > { %1157 = vperm.xlu1 %2079, %v2087_v2  }
 0x370   : > { %v1088_v1 = vpop.permute.xlu2 %1087 }
 0x371   : > { %v1097_v5 = vsub.f32 %v2919_v35, %v1088_v1  ;;  %v1114_v35 = vmul.f32 %v2087_v2, %v1110_v34 }
 0x373   : > { %v1103_v6 = vmul.f32 1.442695, %v1097_v5 }
 0x375   : > { %2088 = vpow2.f32 %v1103_v6 }
 0x378   : > { %v1093_v7 = vpop.permute.xlu2 %1092 }
 0x379   : > { %v1098_v8 = vsub.f32 %v1039_v39, %v1093_v7  ;;  %v1111_v39 = vmul.f32 %v2932_v60, %v1107_v38 }
 0x37b   : > { %v2089_v9 = vpop.eup %2088  ;;  %v1105_v10 = vmul.f32 1.442695, %v1098_v8 }
 0x37c   : > { %v1121_v11 = vsel %vm1046_vm1, %v2089_v9, 0.0 }
 0x37d   : > { %2090 = vpow2.f32 %v1105_v10  ;;  %1122 = vadd.xlane.f32.xlu0 %v1121_v11 }
 0x382   : > { %v1078_v12 = vpop.permute.xlu0 %1077 }
 0x383   : > { %v2091_v13 = vpop.eup %2090  ;;  %v1095_v14 = vsub.f32 %v2915_v33, %v1078_v12 }
 0x384   : > { %v1124_v15 = vsel %vm1046_vm1, %v2091_v13, 0.0  ;;  %v1165_v16 = vpack.c.bf16 %v2091_v13, %v2089_v9 }
 0x385   : > { %v1099_v17 = vmul.f32 1.442695, %v1095_v14  ;;  %1125 = vadd.xlane.f32.xlu1 %v1124_v15 }
 0x386   : > { %1720 = vmatmul.msk.bf16.vlgmr.msra.gmra.mxu3 %vm1046_vm1, %v1165_v16 }
 0x387   : > { %2092 = vpow2.f32 %v1099_v17 }
 0x38a   : > { %v1083_v18 = vpop.permute.xlu1 %1082 }
 0x38b   : > { %v1096_v19 = vsub.f32 %v2923_v37, %v1083_v18 }
 0x38d   : > { %v2093_v20 = vpop.eup %2092  ;;  %v1101_v21 = vmul.f32 1.442695, %v1096_v19 }
 0x38e   : > { %v1115_v22 = vsel %vm1046_vm1, %v2093_v20, 0.0 }
 0x38f   : > { %2094 = vpow2.f32 %v1101_v21  ;;  %1116 = vadd.xlane.f32.xlu2 %v1115_v22 }
 0x392   : > { %v1143_v26 = vpop.permute.xlu1 %1142 }
 0x393   : > { %v1153_v28 = vpop.permute.xlu0 %1152  ;;  %v1160_v55 = vmul.f32 %v1143_v26, %v1136_v52 }
 0x394   : > { %v1162_v44 = vmul.f32 %v1153_v28, %v1138_v42 }
 0x395   : > { %v2095_v23 = vpop.eup %2094 }
 0x396   : > { %v1118_v24 = vsel %vm1046_vm1, %v2095_v23, 0.0  ;;  %v1164_v25 = vpack.c.bf16 %v2095_v23, %v2093_v20 }
 0x397   : > { %1119 = vadd.xlane.f32.xlu2 %v1118_v24 }
 0x398   : > { %1719 = vmatmul.msk.bf16.vlgmr.msra.gmra.mxu1 %vm1046_vm1, %v1164_v25 }
 0x39a   : > { %v1148_v27 = vpop.permute.xlu1 %1147 }
 0x39b   : > { %v1161_v59 = vmul.f32 %v1148_v27, %v1137_v58 }
 0x3a2   : > { %v1158_v31 = vpop.permute.xlu1 %1157 }
 0x3a3   : > { %v1163_v51 = vmul.f32 %v1158_v31, %v1139_v50 }
 0x3f0   : > { %v1123_v32 = vpop.xlane.xlu0 %1122 }
 0x3f1   : > { %v1129_v33 = vadd.f32 %v1123_v32, %v1113_v30 }
 0x3f3   : > { %1134 = vst.msk [vmem:[#allocation4 + $0x10] sm:$0xff] %vm1131_vm2, %v1129_v33 }
 0x3f8   : > { %v1126_v36 = vpop.xlane.xlu1 %1125 }
 0x3f9   : > { %v1130_v37 = vadd.f32 %v1126_v36, %v1114_v35 }
 0x3fb   : > { %1135 = vst.msk [vmem:[#allocation4 + $0x18] sm:$0xff] %vm1131_vm2, %v1130_v37 }
 0x402   : > { %v1117_v40 = vpop.xlane.xlu2 %1116 }
 0x403   : > { %v1127_v41 = vadd.f32 %v1117_v40, %v1111_v39 }
 0x405   : > { %1132 = vst.msk [vmem:[#allocation4] sm:$0xff] %vm1131_vm2, %v1127_v41 }
 0x409   : > { %v1198_v45 = vpop.f32.mrf.mxu3 }
 0x40a   : > { %v1205_v47 = vadd.f32 %v1198_v45, %v1162_v44  ;;  %v1120_v48 = vpop.xlane.xlu2 %1119 }
 0x40b   : > { %v1128_v49 = vadd.f32 %v1120_v48, %v1112_v46 }
 0x40c   : > { %1209 = vst [vmem:[#allocation5] sm:$0xff] %v1205_v47 }
 0x40d   : > { %1133 = vst.msk [vmem:[#allocation4 + $0x8] sm:$0xff] %vm1131_vm2, %v1128_v49 }
 0x411   : > { %v1200_v53 = vpop.f32.mrf.mxu3 }
 0x412   : > { %v1206_v54 = vadd.f32 %v1200_v53, %v1163_v51 }
 0x414   : > { %1210 = vst [vmem:[#allocation5 + $0x18] sm:$0xff] %v1206_v54 }
 0x415   : > { %v1193_v56 = vpop.f32.mrf.mxu1 }
 0x416   : > { %v1203_v57 = vadd.f32 %v1193_v56, %v1160_v55 }
 0x418   : > { %1207 = vst [vmem:[#allocation5 + $0x8] sm:$0xff] %v1203_v57 }
 0x41c   : > { %1218 = sbr.rel (%p1721_p2) target bundleno = 1332 (0x534), region = 108 }
 0x41d   : > { %v1195_v60 = vpop.f32.mrf.mxu1 }
 0x41e   : > { %v1204_v61 = vadd.f32 %v1195_v60, %v1161_v59 }
 0x420   : > { %1208 = vst [vmem:[#allocation5 + $0x10] sm:$0xff] %v1204_v61 }
 0x421   : > { %v1225_v62 = vld [vmem:[#allocation4 + $0x10] sm:$0xff]  ;;  %v1223_v63 = vld [vmem:[#allocation4] sm:$0xff]  ;;  %v2508_v0 = vmov 0   ;;  %v1226_v4 = vld [vmem:[#allocation4 + $0x18] sm:$0xff] }
 0x422   : > { %2097 = vset.pattern.permute.xlu1 %v2508_v0  ;;  %2096 = vset.pattern.permute.xlu0 %v2508_v0  ;;  %2099 = vrcp.f32 %v1225_v62  ;;  %v1801_v2 = vld [vmem:[#allocation19 + $0x38] sm:$0xff]  ;;  %v1800_v3 = vld [vmem:[#allocation19 + $0x30] sm:$0xff]  ;;  %v1224_v1 = vld [vmem:[#allocation4 + $0x8] sm:$0xff] }
 0x423   : > { %2101 = vrcp.f32 %v1223_v63  ;;  %1325 = vmatpush.bf16.msra.mxu0 %v1801_v2  ;;  %1863 = vmatpush.bf16.msra.mxu1 %v1801_v2  ;;  %v1799_v6 = vld [vmem:[#allocation19 + $0x28] sm:$0xff]  ;;  %v1798_v8 = vld [vmem:[#allocation19 + $0x20] sm:$0xff]  ;;  %v1797_v11 = vld [vmem:[#allocation19 + $0x18] sm:$0xff] }
 0x424   : > { %2103 = vrcp.f32 %v1226_v4  ;;  %v1796_v12 = vld [vmem:[#allocation19 + $0x10] sm:$0xff]  ;;  %v1795_v13 = vld [vmem:[#allocation19 + $0x8] sm:$0xff]  ;;  %v1794_v14 = vld [vmem:[#allocation19] sm:$0xff] }
 0x425   : > { %2105 = vrcp.f32 %v1224_v1  ;;  %v1221_v17 = vld [vmem:[#allocation5] sm:$0xff]  ;;  %v1222_v18 = vld [vmem:[#allocation5 + $0x18] sm:$0xff]  ;;  %v1219_v19 = vld [vmem:[#allocation5 + $0x8] sm:$0xff] }
 0x426   : > { %v2098_v29 = vld [vmem:[%s3144_s14] ss:$0 sm:$0xff]  ;;  %v1344_v33 = vld [vmem:[%s2850_s5] sm:$0xff]  ;;  %v1347_v39 = vld [vmem:[%s2850_s5 + $0x18] sm:$0xff] }
 0x427   : > { %1326 = vmatpush.bf16.msra.mxu0 %v1800_v3  ;;  %1864 = vmatpush.bf16.msra.mxu1 %v1800_v3  ;;  %v1220_v20 = vld [vmem:[#allocation5 + $0x10] sm:$0xff]  ;;  %v1345_v41 = vld [vmem:[%s2850_s5 + $0x8] sm:$0xff] }
 0x428   : > { %v2100_v5 = vpop.eup %2099  ;;  %v1346_v31 = vld [vmem:[%s2850_s5 + $0x10] sm:$0xff] }
 0x429   : > { %v2102_v7 = vpop.eup %2101  ;;  %1243 = vperm.xlu1 %2097, %v2100_v5  }
 0x42a   : > { %1233 = vperm.xlu0 %2096, %v2102_v7   ;;  %v2104_v9 = vpop.eup %2103 }
 0x42b   : > { %1327 = vmatpush.bf16.msra.mxu0 %v1799_v6  ;;  %1865 = vmatpush.bf16.msra.mxu1 %v1799_v6  ;;  %v2106_v10 = vpop.eup %2105 }
 0x42f   : > { %1328 = vmatpush.bf16.msra.mxu0 %v1798_v8  ;;  %1866 = vmatpush.bf16.msra.mxu1 %v1798_v8 }
 0x431   : > { %1248 = vperm.xlu1 %2097, %v2104_v9  }
 0x432   : > { %1238 = vperm.xlu0 %2096, %v2106_v10  }
 0x433   : > { %1329 = vmatpush.bf16.msra.mxu0 %v1797_v11  ;;  %1867 = vmatpush.bf16.msra.mxu1 %v1797_v11 }
 0x437   : > { %1330 = vmatpush.bf16.msra.mxu0 %v1796_v12  ;;  %1868 = vmatpush.bf16.msra.mxu1 %v1796_v12 }
 0x43b   : > { %1331 = vmatpush.bf16.msra.mxu0 %v1795_v13  ;;  %1869 = vmatpush.bf16.msra.mxu1 %v1795_v13 }
 0x43f   : > { %1332 = vmatpush.bf16.msra.mxu0 %v1794_v14  ;;  %1870 = vmatpush.bf16.msra.mxu1 %v1794_v14 }
 0x49b   : > { %v1244_v15 = vpop.permute.xlu1 %1243 }
 0x49c   : > { %v1234_v16 = vpop.permute.xlu0 %1233  ;;  %v1253_v22 = vmul.f32 %v1244_v15, %v1221_v17 }
 0x49d   : > { %v1251_v25 = vmul.f32 %v1234_v16, %v1219_v19 }
 0x4a3   : > { %v1249_v21 = vpop.permute.xlu1 %1248 }
 0x4a4   : > { %v1254_v23 = vmul.f32 %v1249_v21, %v1222_v18  ;;  %v1239_v24 = vpop.permute.xlu0 %1238 }
 0x4a5   : > { %v1252_v26 = vmul.f32 %v1239_v24, %v1220_v20 }
 0x4a6   : > { %v1256_v27 = vpack.c.bf16 %v1254_v23, %v1253_v22 }
 0x4a7   : > { %v1255_v28 = vpack.c.bf16 %v1252_v26, %v1251_v25 }
 0x4a8   : > { %1338 = vmatmul.bf16.vlgmr.msra.gmra.mxu1 %v1256_v27 }
 0x4a9   : > { %1333 = vmatmul.bf16.vlgmr.msra.gmra.mxu0 %v1255_v28 }
 0x525   : > { %v1339_v30 = vpop.f32.mrf.mxu1 }
 0x526   : > { %v1334_v32 = vpop.f32.mrf.mxu0  ;;  %v1340_v34 = vadd.f32 %v2098_v29, %v1339_v30 }
 0x527   : > { %v1335_v35 = vadd.f32 %v2098_v29, %v1334_v32 }
 0x528   : > { %v1350_v36 = vadd.f32 %v1346_v31, %v1340_v34 }
 0x529   : > { %v1348_v37 = vadd.f32 %v1344_v33, %v1335_v35 }
 0x52a   : > { %1354 = vst [vmem:[%s2886_s0 + $0x10] sm:$0xff] %v1350_v36 }
 0x52b   : > { %1352 = vst [vmem:[%s2886_s0] sm:$0xff] %v1348_v37 }
 0x52d   : > { %v1341_v38 = vpop.f32.mrf.mxu1 }
 0x52e   : > { %v1336_v40 = vpop.f32.mrf.mxu0  ;;  %v1342_v42 = vadd.f32 %v2098_v29, %v1341_v38 }
 0x52f   : > { %v1337_v43 = vadd.f32 %v2098_v29, %v1336_v40 }
 0x530   : > { %v1351_v44 = vadd.f32 %v1347_v39, %v1342_v42 }
 0x531   : > { %v1349_v45 = vadd.f32 %v1345_v41, %v1337_v43 }
 0x532   : > { %1355 = vst [vmem:[%s2886_s0 + $0x18] sm:$0xff] %v1351_v44 }
 0x533   : > { %1353 = vst [vmem:[%s2886_s0 + $0x8] sm:$0xff] %v1349_v45 }
 0x534 PF: > { %s3145_s11 = sld [smem:[#allocation33_spill]]  ;;  %s1371_s15 = sshll.u32 %s2886_s0, 4  ;;  %s1372_s15 = int_to_ptr.vmem [resolvable:$true] %s1371_s15 }
 0x535   : > { %s3146_s2 = sld [smem:[#allocation34_spill]]  ;;  %s1357_s24 = scalar_lea.sflag [#allocation10], %s2846_s23 }
 0x536   : > { %s3147_s21 = sld [smem:[#allocation56_spill]] }
 0x53a   : > { %s1755_s3 = sshll.u32 %s3145_s11, 2 }
 0x53b   : > { %s1756_s22 = sshll.u32 %s3146_s2, 3 }
 0x53c   : > { %s1368_s20 = sadd.s32 %s1756_s22, %s1755_s3  ;;  %s3148_s9 = smov %s3147_s21 }
 0x53d   : > { %s1757_s7 = sshll.u32 %s1368_s20, 3  ;;  %s2337_s0 = scalar_lea.hbm %s3148_s9, 128 }
 0x53e   : > { %s1370_s25 = scalar_lea.hbm %s3147_s21, %s1757_s7 }
 0x53f   : > { %s1373_s12 = sshll.u32 %s1370_s25, 4  ;;  %s1374_s12 = int_to_ptr.hbm [resolvable:$true] %s1373_s12 }
 0x540   : > { %s2331_s29 = sshra.s32 %s1374_s12, 4  ;;  %s2332_s29 = int_to_ptr.hbm [resolvable:$true] %s2331_s29 }
 0x541   : > { %s2333_s6 = scalar_lea.hbm %s2332_s29, 32  ;;  %p2338_p9 = scmp.lt.s32.totalorder %s2332_s29, %s3148_s9 }
 0x542   : > { %p2334_p4 = scmp.ne.s32.totalorder %s2332_s29, %s2333_s6  ;;  %p2339_p10 = scmp.lt.s32.totalorder %s2337_s0, %s2333_s6 }
 0x544   : > { %p2335_p8 = pnand %p2334_p4, %p2796_p5  ;;  %p2340_p11 = por %p2339_p10, %p2338_p9 }
 0x546   : > { %p2336_p6 = pneg %p2335_p8 }
 0x548   : > { %p2341_p12 = pnand %p2340_p11, %p2336_p6 }
 0x54a   : > { %2344 = shalt.err (!%p2341_p12)
}
 0x54b   : > { %s2509_s23 = smov 128   ;;  %s2510_s11 = smov 8  }
 0x54c   : > { %1893 = dma.vmem_to_hbm [thread:$0]  (%p2796_p5), %s1372_s15, 512, %s1374_s12, %s1357_s24, %s2509_s23, %s2509_s23, %s2510_s11  }
 0x54d PF: > { %p1931_p13 = scmp.ge.s32.totalorder %s2495_s18, 2  ;;  %s1388_s2 = sand.u32 1, %s2459_s27  }
 0x54e   : > { %p3149_p0 = scmp.ne.s32.totalorder %s3122_s30, 0  ;;  %s1389_s3 = scalar_lea.sflag [#allocation10], %s1388_s2 }
 0x550   : > { %p1919_p3 = pnand %p1931_p13, %p3149_p0 }
 0x552   : > { %p1920_p7 = pneg %p1919_p3 }
 0x554   : > { %2430 = dma.done.wait (%p1920_p7), %s1389_s3, 512  }
 0x555   : > { %2432 = vsyncadd (%p1920_p7), %s1389_s3, 4294966784  ;;  %s33_s18 = sadd.s32 1, %s2495_s18   ;;  %s3151_s21 = sld [smem:[#allocation28_spill]] }
 0x556   : > { %p2989_p1 = scmp.ge.s32.totalorder %s33_s18, 10   ;;  %s3152_s8 = sld [smem:[#allocation29_spill]] }
 0x557   : > { %s3153_s24 = sld [smem:[#allocation30_spill]]  ;;  %s3163_s23 = smov %s2825_s1 }
 0x558   : > { %s3154_s15 = sld [smem:[#allocation31_spill]]  ;;  %s3164_s25 = smov %s2455_s26 }
 0x559   : > { %s3155_s29 = sld [smem:[#allocation43_spill]]  ;;  %s3165_s26 = smov %s2737_s4 }
 0x55a   : > { %s3156_s30 = sld [smem:[#allocation35_spill]]  ;;  %s3166_s27 = smov %s2463_s28 }
 0x55b   : > { %s3157_s13 = sld [smem:[#allocation36_spill]]  ;;  %s3168_s14 = smov %s2491_s17 }
 0x55c   : > { %s3158_s20 = sld [smem:[#allocation38_spill]]  ;;  %s3162_s22 = smov %s3152_s8 }
 0x55d   : > { %s3159_s16 = sld [smem:[#allocation39_spill]] }
 0x55e   : > { %s3160_s7 = sld [smem:[#allocation40_spill]]  ;;  %s3167_s28 = smov %s3154_s15 }
 0x560   :  { %32 = sbr.rel (!%p2989_p1) target bundleno = 29 (0x1d), region = 172 }
 0x562   : > { %s3169_s15 = smov %s3158_s20 }
 0x564   : > { %s3170_s17 = smov %s3160_s7 }
 0x565   :  { %1395 = vsyncpa [#allocation9], 1 }
 0x566   :  { %1397 = vsyncpa [#allocation9 + $0x1], 1 }
 0x567   :  { %1398 = vsyncpa [#allocation12], 1 }
 0x568   :  { %1400 = vsyncpa [#allocation12 + $0x1], 1 }
 0x569   :  { %1401 = vsyncpa [#allocation15], 1 }
 0x56a   :  { %1402 = vsyncpa [#allocation18], 1 }
 0x56b   :  { %1403 = vsyncpa [#allocation10], 1 }
 0x56c   :  { %1405 = vsyncpa [#allocation10 + $0x1], 1 }

</bundles_post_ra>
